<compile_context>
chip_gen: v7x
topology: tpu7x:2x2x1
jax: 0.10.0
libtpu: 0.0.40
codegen_flags: <defaults>
</compile_context>

<pallas_src>
import functools

import jax
import jax.numpy as jnp
from jax.experimental import pallas as pl
from jax.experimental.pallas import tpu as pltpu


def _up_conv_kernel(x_ref, w_ref, scale_ref, shift_ref, o_ref, *, H, W, C_in, C_out):
    # x_ref:     (1, H, W, C_in)      original-resolution NHWC tile (matmul dtype, e.g. bf16)
    # w_ref:     (4, 4*C_in, C_out)   per-phase folded 2x2-tap weights, K laid out as (dy,dx,ci)
    # scale_ref: (1, C_out)  f32      folded BN scale  (gamma / sqrt(var+eps))
    # shift_ref: (1, C_out)  f32      folded BN shift  ((conv_bias - mean)*scale + beta)
    # o_ref:     (1, H*W, 4*C_out)    phases packed along channels: [pi*2+pj]*C_out + c
    x = x_ref[0]                                            # (H, W, C_in)
    dt = x.dtype
    zcol = jnp.zeros((H, 1, C_in), dt)
    zrow = jnp.zeros((1, W, C_in), dt)

    # Column-shifted variants, built once and reused by all phases/row-shifts:
    #   col_var[c0][a, b, :] == X[a, b + c0 - 1, :]   (zero outside [0, W))
    col_var = (
        jnp.concatenate([zcol, x[:, :W - 1, :]], axis=1),   # c0 = 0
        x,                                                  # c0 = 1
        jnp.concatenate([x[:, 1:, :], zcol], axis=1),       # c0 = 2
    )

    def tap(r0, c0):
        # T[a, b, :] == X[a + r0 - 1, b + c0 - 1, :]   (zero outside bounds)
        v = col_var[c0]
        if r0 == 0:
            v = jnp.concatenate([zrow, v[:H - 1]], axis=0)  # leading-dim shift (cheap)
        elif r0 == 2:
            v = jnp.concatenate([v[1:], zrow], axis=0)
        return v.reshape(H * W, C_in)

    scale = scale_ref[0][None, :]                           # hoisted broadcasts
    shift = shift_ref[0][None, :]

    outs = []
    for pi in range(2):
        for pj in range(2):
            # Fused 4-tap, wide-K matmul for this output phase.
            lhs = jnp.concatenate(
                [tap(pi + dy, pj + dx) for dy in range(2) for dx in range(2)],
                axis=-1)                                    # (H*W, 4*C_in)
            acc = jax.lax.dot_general(
                lhs, w_ref[pi * 2 + pj],
                (((1,), (0,)), ((), ())),
                preferred_element_type=jnp.float32)         # (H*W, C_out), f32 accumulate
            y = acc * scale + shift                         # folded conv bias + BN (eval stats)
            outs.append(jnp.maximum(y, 0.0).astype(o_ref.dtype))

    # One channel-packed store (lane width 4*C_out).
    o_ref[0] = jnp.concatenate(outs, axis=-1)


def up_conv_forward(x_nchw, conv_w, conv_b, gamma, beta, running_mean, running_var,
                    eps=1e-5, matmul_dtype=jnp.bfloat16):
    """x_nchw: (N, C_in, H, W) -> (N, C_out, 2H, 2W), matching the PyTorch module
    (BatchNorm evaluated with running statistics)."""
    N, C_in, H, W = x_nchw.shape
    C_out = conv_w.shape[0]
    out_dtype = x_nchw.dtype

    # NCHW -> NHWC + cast to the MXU dtype, fused into one XLA pass. No upsample/pad in HBM.
    x_nhwc = jnp.transpose(x_nchw, (0, 2, 3, 1)).astype(matmul_dtype)     # (N, H, W, C_in)

    # Subpixel/phase-combined 2x2-tap weights.
    # A[p, d, k] = 1 iff 3x3 tap index k contributes to output phase p, original-grid tap d
    # (per axis): nearest-2x upsample followed by a 3-tap conv collapses to 2 taps per phase.
    A = jnp.array([[[1., 0., 0.], [0., 1., 1.]],
                   [[1., 1., 0.], [0., 0., 1.]]], jnp.float32)            # (phase, tap, k)
    w_hwio = jnp.transpose(conv_w, (2, 3, 1, 0)).astype(jnp.float32)      # (3, 3, C_in, C_out)
    wp = jnp.einsum('pyk,qxl,klio->pqyxio', A, A, w_hwio)                 # (2,2,2,2,C_in,C_out)
    wp = wp.reshape(4, 4 * C_in, C_out).astype(matmul_dtype)

    # Fold conv bias + BatchNorm (eval, running stats) into per-channel scale/shift (f32).
    scale = (gamma / jnp.sqrt(running_var + eps)).astype(jnp.float32)
    shift = ((conv_b - running_mean) * scale + beta).astype(jnp.float32)
    scale2 = scale.reshape(1, C_out)
    shift2 = shift.reshape(1, C_out)

    kernel = functools.partial(_up_conv_kernel, H=H, W=W, C_in=C_in, C_out=C_out)

    # VMEM budget sized to the actual blocks (double-buffered) + in-kernel temporaries.
    isz = jnp.dtype(matmul_dtype).itemsize
    osz = jnp.dtype(out_dtype).itemsize
    blk_bytes = H * W * C_in * isz + 16 * C_in * C_out * isz + H * W * 4 * C_out * osz
    tmp_bytes = 2 * H * W * (4 * C_in * isz + 4 * C_out * 4)
    vmem_limit = int(min(max(2 * blk_bytes + tmp_bytes + (8 << 20), 32 << 20), 64 << 20))

    out = pl.pallas_call(
        kernel,
        out_shape=jax.ShapeDtypeStruct((N, H * W, 4 * C_out), out_dtype),
        grid_spec=pltpu.PrefetchScalarGridSpec(
            num_scalar_prefetch=0,
            grid=(N,),     # independent images -> "parallel" (megacore / 2-TC sharding)
            in_specs=[
                pl.BlockSpec((1, H, W, C_in), lambda n: (n, 0, 0, 0)),
                # TODO(synk): the grid-invariant operands below could use
                # pipeline_mode=pl.Buffered(1) to skip double-buffering where supported.
                pl.BlockSpec((4, 4 * C_in, C_out), lambda n: (0, 0, 0)),
                pl.BlockSpec((1, C_out), lambda n: (0, 0)),
                pl.BlockSpec((1, C_out), lambda n: (0, 0)),
            ],
            out_specs=pl.BlockSpec((1, H * W, 4 * C_out), lambda n: (n, 0, 0)),
        ),
        compiler_params=pltpu.CompilerParams(
            dimension_semantics=("parallel",),
            vmem_limit_bytes=vmem_limit),
    )(x_nhwc, wp, scale2, shift2)

    # Single output pass: un-pack phases (pixel shuffle) AND NHWC->NCHW together.
    out = out.reshape(N, H, W, 2, 2, C_out)              # (n, a, b, pi, pj, c)
    out = jnp.transpose(out, (0, 5, 1, 3, 2, 4))         # (n, c, a, pi, b, pj)
    return out.reshape(N, C_out, 2 * H, 2 * W)
    # TODO(synk): for very large H on v7x (64 MiB VMEM) add a row-tiled grid axis with a
    # 1-row halo instead of whole-image blocks.


def _reference(x_nchw, conv_w, conv_b, gamma, beta, running_mean, running_var, eps=1e-5):
    x = jnp.repeat(jnp.repeat(x_nchw, 2, axis=2), 2, axis=3)
    y = jax.lax.conv_general_dilated(
        x, conv_w, window_strides=(1, 1), padding=((1, 1), (1, 1)),
        dimension_numbers=("NCHW", "OIHW", "NCHW"))
    y = y + conv_b[None, :, None, None]
    s = gamma / jnp.sqrt(running_var + eps)
    y = (y - running_mean[None, :, None, None]) * s[None, :, None, None] \
        + beta[None, :, None, None]
    return jnp.maximum(y, 0.0)


if __name__ == "__main__":
    key = jax.random.PRNGKey(0)
    k_x, k_w, k_b, k_g, k_bt, k_rm, k_rv = jax.random.split(key, 7)

    N, C_in, C_out, H, W = 2, 4, 8, 16, 16

    x = jax.random.normal(k_x, (N, C_in, H, W), jnp.float32)
    conv_w = jax.random.normal(k_w, (C_out, C_in, 3, 3), jnp.float32) * 0.1
    conv_b = jax.random.normal(k_b, (C_out,), jnp.float32) * 0.1
    gamma = 1.0 + 0.1 * jax.random.normal(k_g, (C_out,), jnp.float32)
    beta = 0.1 * jax.random.normal(k_bt, (C_out,), jnp.float32)
    running_mean = 0.1 * jax.random.normal(k_rm, (C_out,), jnp.float32)
    running_var = jnp.abs(1.0 + 0.1 * jax.random.normal(k_rv, (C_out,), jnp.float32))
    # TODO(synk): PyTorch module in training mode would use batch statistics for BatchNorm;
    # here BN is evaluated with (synthetic) running statistics folded into scale/shift.

    out = up_conv_forward(x, conv_w, conv_b, gamma, beta, running_mean, running_var)
    out = jax.block_until_ready(out)

    ref = _reference(x, conv_w, conv_b, gamma, beta, running_mean, running_var)
    assert out.shape == (N, C_out, 2 * H, 2 * W)
    # bf16 MXU operands with f32 accumulation -> looser tolerance than the pure-f32 version.
    assert jnp.allclose(out, ref, atol=5e-2, rtol=5e-2)

    print("KERNEL_OK")
</pallas_src>

<mosaic_0001>
module attributes {stable_mosaic.version = 11 : i64} {
  func.func @_up_conv_kernel(%arg0: i32, %arg1: memref<1x16x16x4xbf16, #tpu.memory_space<vmem>>, %arg2: memref<4x16x8xbf16, #tpu.memory_space<vmem>>, %arg3: memref<1x8xf32, #tpu.memory_space<vmem>>, %arg4: memref<1x8xf32, #tpu.memory_space<vmem>>, %arg5: memref<1x256x32xf32, #tpu.memory_space<vmem>>) attributes {dimension_semantics = [#tpu.dimension_semantics<parallel>], iteration_bounds = array<i64: 2>, scalar_prefetch = 0 : i64, scratch_operands = 0 : i64, tpu.core_type = #tpu.core_type<tc>, window_params = [{transform_indices = @transform_0, window_bounds = array<i64: 1, 16, 16, 4>}, {pipeline_mode = #tpu.pipeline_mode<synchronous>, transform_indices = @transform_1, window_bounds = array<i64: 4, 16, 8>}, {pipeline_mode = #tpu.pipeline_mode<synchronous>, transform_indices = @transform_2, window_bounds = array<i64: 1, 8>}, {pipeline_mode = #tpu.pipeline_mode<synchronous>, transform_indices = @transform_3, window_bounds = array<i64: 1, 8>}, {transform_indices = @transform_4, window_bounds = array<i64: 1, 256, 32>}]} {
    %c0 = arith.constant 0 : index
    %c0_0 = arith.constant 0 : index
    %c0_1 = arith.constant 0 : index
    %c0_2 = arith.constant 0 : index
    %0 = vector.load %arg1[%c0, %c0_0, %c0_1, %c0_2] : memref<1x16x16x4xbf16, #tpu.memory_space<vmem>>, vector<1x16x16x4xbf16>
    %1 = vector.shape_cast %0 : vector<1x16x16x4xbf16> to vector<16x16x4xbf16>
    %cst = arith.constant 0.000000e+00 : bf16
    %2 = vector.broadcast %cst : bf16 to vector<16x1x4xbf16>
    %cst_3 = arith.constant 0.000000e+00 : bf16
    %3 = vector.broadcast %cst_3 : bf16 to vector<1x16x4xbf16>
    %4 = vector.extract_strided_slice %1 {offsets = [0, 0, 0], sizes = [16, 15, 4], strides = [1, 1, 1]} : vector<16x16x4xbf16> to vector<16x15x4xbf16>
    %5 = tpu.concatenate %2, %4 in 1 : vector<16x1x4xbf16>, vector<16x15x4xbf16> -> vector<16x16x4xbf16>
    %6 = vector.extract_strided_slice %1 {offsets = [0, 1, 0], sizes = [16, 15, 4], strides = [1, 1, 1]} : vector<16x16x4xbf16> to vector<16x15x4xbf16>
    %7 = tpu.concatenate %6, %2 in 1 : vector<16x15x4xbf16>, vector<16x1x4xbf16> -> vector<16x16x4xbf16>
    %c0_4 = arith.constant 0 : index
    %c0_5 = arith.constant 0 : index
    %8 = vector.load %arg3[%c0_4, %c0_5] : memref<1x8xf32, #tpu.memory_space<vmem>>, vector<1x8xf32>
    %9 = vector.shape_cast %8 : vector<1x8xf32> to vector<8xf32>
    %10 = vector.shape_cast %9 : vector<8xf32> to vector<1x8xf32>
    %c0_6 = arith.constant 0 : index
    %c0_7 = arith.constant 0 : index
    %11 = vector.load %arg4[%c0_6, %c0_7] : memref<1x8xf32, #tpu.memory_space<vmem>>, vector<1x8xf32>
    %12 = vector.shape_cast %11 : vector<1x8xf32> to vector<8xf32>
    %13 = vector.shape_cast %12 : vector<8xf32> to vector<1x8xf32>
    %14 = vector.extract_strided_slice %5 {offsets = [0, 0, 0], sizes = [15, 16, 4], strides = [1, 1, 1]} : vector<16x16x4xbf16> to vector<15x16x4xbf16>
    %15 = tpu.concatenate %3, %14 in 0 : vector<1x16x4xbf16>, vector<15x16x4xbf16> -> vector<16x16x4xbf16>
    %16 = vector.shape_cast %15 : vector<16x16x4xbf16> to vector<256x4xbf16>
    %17 = vector.extract_strided_slice %1 {offsets = [0, 0, 0], sizes = [15, 16, 4], strides = [1, 1, 1]} : vector<16x16x4xbf16> to vector<15x16x4xbf16>
    %18 = tpu.concatenate %3, %17 in 0 : vector<1x16x4xbf16>, vector<15x16x4xbf16> -> vector<16x16x4xbf16>
    %19 = vector.shape_cast %18 : vector<16x16x4xbf16> to vector<256x4xbf16>
    %20 = vector.shape_cast %5 : vector<16x16x4xbf16> to vector<256x4xbf16>
    %21 = vector.shape_cast %1 : vector<16x16x4xbf16> to vector<256x4xbf16>
    %22 = tpu.concatenate %16, %19, %20, %21 in 1 : vector<256x4xbf16>, vector<256x4xbf16>, vector<256x4xbf16>, vector<256x4xbf16> -> vector<256x16xbf16>
    %c0_8 = arith.constant 0 : index
    %c0_9 = arith.constant 0 : index
    %c0_10 = arith.constant 0 : index
    %23 = vector.load %arg2[%c0_8, %c0_9, %c0_10] : memref<4x16x8xbf16, #tpu.memory_space<vmem>>, vector<1x16x8xbf16>
    %24 = vector.shape_cast %23 : vector<1x16x8xbf16> to vector<16x8xbf16>
    %cst_11 = arith.constant dense<0.000000e+00> : vector<256x8xf32>
    %25 = tpu.matmul %22, %24, %cst_11 {dimension_numbers = #tpu.dot_dimension_numbers<[1], [0], [0], [1], [0, 0, 1, 1], [], []>} : vector<256x16xbf16>, vector<16x8xbf16>, vector<256x8xf32> -> vector<256x8xf32>
    %26 = vector.broadcast %10 : vector<1x8xf32> to vector<256x8xf32>
    %27 = arith.mulf %25, %26 : vector<256x8xf32>
    %28 = vector.broadcast %13 : vector<1x8xf32> to vector<256x8xf32>
    %29 = arith.addf %27, %28 : vector<256x8xf32>
    %cst_12 = arith.constant 0.000000e+00 : f32
    %30 = vector.broadcast %cst_12 : f32 to vector<256x8xf32>
    %31 = arith.maximumf %29, %30 : vector<256x8xf32>
    %32 = vector.extract_strided_slice %1 {offsets = [0, 0, 0], sizes = [15, 16, 4], strides = [1, 1, 1]} : vector<16x16x4xbf16> to vector<15x16x4xbf16>
    %33 = tpu.concatenate %3, %32 in 0 : vector<1x16x4xbf16>, vector<15x16x4xbf16> -> vector<16x16x4xbf16>
    %34 = vector.shape_cast %33 : vector<16x16x4xbf16> to vector<256x4xbf16>
    %35 = vector.extract_strided_slice %7 {offsets = [0, 0, 0], sizes = [15, 16, 4], strides = [1, 1, 1]} : vector<16x16x4xbf16> to vector<15x16x4xbf16>
    %36 = tpu.concatenate %3, %35 in 0 : vector<1x16x4xbf16>, vector<15x16x4xbf16> -> vector<16x16x4xbf16>
    %37 = vector.shape_cast %36 : vector<16x16x4xbf16> to vector<256x4xbf16>
    %38 = vector.shape_cast %1 : vector<16x16x4xbf16> to vector<256x4xbf16>
    %39 = vector.shape_cast %7 : vector<16x16x4xbf16> to vector<256x4xbf16>
    %40 = tpu.concatenate %34, %37, %38, %39 in 1 : vector<256x4xbf16>, vector<256x4xbf16>, vector<256x4xbf16>, vector<256x4xbf16> -> vector<256x16xbf16>
    %c1 = arith.constant 1 : index
    %c0_13 = arith.constant 0 : index
    %c0_14 = arith.constant 0 : index
    %41 = vector.load %arg2[%c1, %c0_13, %c0_14] : memref<4x16x8xbf16, #tpu.memory_space<vmem>>, vector<1x16x8xbf16>
    %42 = vector.shape_cast %41 : vector<1x16x8xbf16> to vector<16x8xbf16>
    %cst_15 = arith.constant dense<0.000000e+00> : vector<256x8xf32>
    %43 = tpu.matmul %40, %42, %cst_15 {dimension_numbers = #tpu.dot_dimension_numbers<[1], [0], [0], [1], [0, 0, 1, 1], [], []>} : vector<256x16xbf16>, vector<16x8xbf16>, vector<256x8xf32> -> vector<256x8xf32>
    %44 = vector.broadcast %10 : vector<1x8xf32> to vector<256x8xf32>
    %45 = arith.mulf %43, %44 : vector<256x8xf32>
    %46 = vector.broadcast %13 : vector<1x8xf32> to vector<256x8xf32>
    %47 = arith.addf %45, %46 : vector<256x8xf32>
    %cst_16 = arith.constant 0.000000e+00 : f32
    %48 = vector.broadcast %cst_16 : f32 to vector<256x8xf32>
    %49 = arith.maximumf %47, %48 : vector<256x8xf32>
    %50 = vector.shape_cast %5 : vector<16x16x4xbf16> to vector<256x4xbf16>
    %51 = vector.shape_cast %1 : vector<16x16x4xbf16> to vector<256x4xbf16>
    %52 = vector.extract_strided_slice %5 {offsets = [1, 0, 0], sizes = [15, 16, 4], strides = [1, 1, 1]} : vector<16x16x4xbf16> to vector<15x16x4xbf16>
    %53 = tpu.concatenate %52, %3 in 0 : vector<15x16x4xbf16>, vector<1x16x4xbf16> -> vector<16x16x4xbf16>
    %54 = vector.shape_cast %53 : vector<16x16x4xbf16> to vector<256x4xbf16>
    %55 = vector.extract_strided_slice %1 {offsets = [1, 0, 0], sizes = [15, 16, 4], strides = [1, 1, 1]} : vector<16x16x4xbf16> to vector<15x16x4xbf16>
    %56 = tpu.concatenate %55, %3 in 0 : vector<15x16x4xbf16>, vector<1x16x4xbf16> -> vector<16x16x4xbf16>
    %57 = vector.shape_cast %56 : vector<16x16x4xbf16> to vector<256x4xbf16>
    %58 = tpu.concatenate %50, %51, %54, %57 in 1 : vector<256x4xbf16>, vector<256x4xbf16>, vector<256x4xbf16>, vector<256x4xbf16> -> vector<256x16xbf16>
    %c2 = arith.constant 2 : index
    %c0_17 = arith.constant 0 : index
    %c0_18 = arith.constant 0 : index
    %59 = vector.load %arg2[%c2, %c0_17, %c0_18] : memref<4x16x8xbf16, #tpu.memory_space<vmem>>, vector<1x16x8xbf16>
    %60 = vector.shape_cast %59 : vector<1x16x8xbf16> to vector<16x8xbf16>
    %cst_19 = arith.constant dense<0.000000e+00> : vector<256x8xf32>
    %61 = tpu.matmul %58, %60, %cst_19 {dimension_numbers = #tpu.dot_dimension_numbers<[1], [0], [0], [1], [0, 0, 1, 1], [], []>} : vector<256x16xbf16>, vector<16x8xbf16>, vector<256x8xf32> -> vector<256x8xf32>
    %62 = vector.broadcast %10 : vector<1x8xf32> to vector<256x8xf32>
    %63 = arith.mulf %61, %62 : vector<256x8xf32>
    %64 = vector.broadcast %13 : vector<1x8xf32> to vector<256x8xf32>
    %65 = arith.addf %63, %64 : vector<256x8xf32>
    %cst_20 = arith.constant 0.000000e+00 : f32
    %66 = vector.broadcast %cst_20 : f32 to vector<256x8xf32>
    %67 = arith.maximumf %65, %66 : vector<256x8xf32>
    %68 = vector.shape_cast %1 : vector<16x16x4xbf16> to vector<256x4xbf16>
    %69 = vector.shape_cast %7 : vector<16x16x4xbf16> to vector<256x4xbf16>
    %70 = vector.extract_strided_slice %1 {offsets = [1, 0, 0], sizes = [15, 16, 4], strides = [1, 1, 1]} : vector<16x16x4xbf16> to vector<15x16x4xbf16>
    %71 = tpu.concatenate %70, %3 in 0 : vector<15x16x4xbf16>, vector<1x16x4xbf16> -> vector<16x16x4xbf16>
    %72 = vector.shape_cast %71 : vector<16x16x4xbf16> to vector<256x4xbf16>
    %73 = vector.extract_strided_slice %7 {offsets = [1, 0, 0], sizes = [15, 16, 4], strides = [1, 1, 1]} : vector<16x16x4xbf16> to vector<15x16x4xbf16>
    %74 = tpu.concatenate %73, %3 in 0 : vector<15x16x4xbf16>, vector<1x16x4xbf16> -> vector<16x16x4xbf16>
    %75 = vector.shape_cast %74 : vector<16x16x4xbf16> to vector<256x4xbf16>
    %76 = tpu.concatenate %68, %69, %72, %75 in 1 : vector<256x4xbf16>, vector<256x4xbf16>, vector<256x4xbf16>, vector<256x4xbf16> -> vector<256x16xbf16>
    %c3 = arith.constant 3 : index
    %c0_21 = arith.constant 0 : index
    %c0_22 = arith.constant 0 : index
    %77 = vector.load %arg2[%c3, %c0_21, %c0_22] : memref<4x16x8xbf16, #tpu.memory_space<vmem>>, vector<1x16x8xbf16>
    %78 = vector.shape_cast %77 : vector<1x16x8xbf16> to vector<16x8xbf16>
    %cst_23 = arith.constant dense<0.000000e+00> : vector<256x8xf32>
    %79 = tpu.matmul %76, %78, %cst_23 {dimension_numbers = #tpu.dot_dimension_numbers<[1], [0], [0], [1], [0, 0, 1, 1], [], []>} : vector<256x16xbf16>, vector<16x8xbf16>, vector<256x8xf32> -> vector<256x8xf32>
    %80 = vector.broadcast %10 : vector<1x8xf32> to vector<256x8xf32>
    %81 = arith.mulf %79, %80 : vector<256x8xf32>
    %82 = vector.broadcast %13 : vector<1x8xf32> to vector<256x8xf32>
    %83 = arith.addf %81, %82 : vector<256x8xf32>
    %cst_24 = arith.constant 0.000000e+00 : f32
    %84 = vector.broadcast %cst_24 : f32 to vector<256x8xf32>
    %85 = arith.maximumf %83, %84 : vector<256x8xf32>
    %86 = tpu.concatenate %31, %49, %67, %85 in 1 : vector<256x8xf32>, vector<256x8xf32>, vector<256x8xf32>, vector<256x8xf32> -> vector<256x32xf32>
    %c0_25 = arith.constant 0 : index
    %c0_26 = arith.constant 0 : index
    %c0_27 = arith.constant 0 : index
    %87 = vector.load %arg5[%c0_25, %c0_26, %c0_27] : memref<1x256x32xf32, #tpu.memory_space<vmem>>, vector<1x256x32xf32>
    %88 = vector.shape_cast %87 : vector<1x256x32xf32> to vector<256x32xf32>
    %89 = vector.shape_cast %86 : vector<256x32xf32> to vector<1x256x32xf32>
    tpu.vector_store %arg5[%c0_25, %c0_26, %c0_27], %89 {strides = array<i32>} : memref<1x256x32xf32, #tpu.memory_space<vmem>>, vector<1x256x32xf32>,
    return
  }
  func.func @transform_0(%arg0: i32) -> (i32, i32, i32, i32) {
    %c0_i32 = arith.constant 0 : i32
    %c0_i32_0 = arith.constant 0 : i32
    %c0_i32_1 = arith.constant 0 : i32
    %c0_i32_2 = arith.constant 0 : i32
    return %arg0, %c0_i32, %c0_i32_0, %c0_i32_1 : i32, i32, i32, i32
  }
  func.func @transform_1(%arg0: i32) -> (i32, i32, i32) {
    %c0_i32 = arith.constant 0 : i32
    %c0_i32_0 = arith.constant 0 : i32
    %c0_i32_1 = arith.constant 0 : i32
    %c0_i32_2 = arith.constant 0 : i32
    return %c0_i32, %c0_i32_0, %c0_i32_1 : i32, i32, i32
  }
  func.func @transform_2(%arg0: i32) -> (i32, i32) {
    %c0_i32 = arith.constant 0 : i32
    %c0_i32_0 = arith.constant 0 : i32
    %c0_i32_1 = arith.constant 0 : i32
    return %c0_i32, %c0_i32_0 : i32, i32
  }
  func.func @transform_3(%arg0: i32) -> (i32, i32) {
    %c0_i32 = arith.constant 0 : i32
    %c0_i32_0 = arith.constant 0 : i32
    %c0_i32_1 = arith.constant 0 : i32
    return %c0_i32, %c0_i32_0 : i32, i32
  }
  func.func @transform_4(%arg0: i32) -> (i32, i32, i32) {
    %c0_i32 = arith.constant 0 : i32
    %c0_i32_0 = arith.constant 0 : i32
    %c0_i32_1 = arith.constant 0 : i32
    return %arg0, %c0_i32, %c0_i32_0 : i32, i32, i32
  }
}

</mosaic_0001>

<bundles_post_ra>
// kernel: tpu_custom_call.1
= control target key start
LH: loop header
LB: loop body
LE: loop exit
PB: predicated region body
PF: predicated region fallthrough
CT: control target
= control target key end

     0   :  { %s3094_s15 = smov 0   ;;  %s4677_s0 = inlined_call_operand.vmem [shape: bf16[2,16,16,4], index: 0, kind: input, shape index: {}]   ;;  %s4678_s1 = inlined_call_operand.vmem [shape: bf16[4,16,8], index: 1, kind: input, shape index: {}]   ;;  %s4679_s2 = inlined_call_operand.vmem [shape: f32[1,8], index: 2, kind: input, shape index: {}]   ;;  %s4680_s3 = inlined_call_operand.vmem [shape: f32[1,8], index: 3, kind: input, shape index: {}]   ;;  %s4681_s4 = inlined_call_operand.vmem [shape: f32[2,256,32], index: 4, kind: output, shape index: {}]  }
   0x1 LB: > { %s2699_s16 = sadd.s32 4294967295, %s3061_s15   ;;  %p2703_p0 = scmp.ge.s32.totalorder %s3061_s15, 1  ;;  %s3061_s15 = sphi %s3094_s15, %s14_s15  }
   0x2   : > { %p162_p1 = scmp.lt.s32.totalorder %s3061_s15, 3 }
   0x4   : > { %p163_p2 = pnand %p2703_p0, %p162_p1 }
   0x6   : > { %166 = sbr.rel (%p163_p2) target bundleno = 792 (0x318), region = 36 }
   0xd   : > { %p188_p3 = scmp.lt.s32.totalorder %s2699_s16, 1  ;;  %v3063_v0 = vmov 0   ;;  %s3064_s17 = smov 4   ;;  %vm440_vm0 = vsmask.f32 256  ;;  %v3044_v1 = vld [vmem:[%s4678_s1] sm:$0xff]  }
   0xe   : > { %528 = vrot.lane.b32.xlu0 %v3063_v0, %s3064_s17  ;;  %2873 = vmatprep.subr.bf16.mxu0 %v3044_v1  ;;  %vm439_vm1 = vcmask 1040384   ;;  %s3065_s24 = smov 12   ;;  %vm506_vm3 = vcmask 1047552   ;;  %vm507_vm4 = vsmask.f32 7424  ;;  %s3066_s25 = smov 8  }
   0xf   : > { %s4719_s16 = smov (!%p188_p3, %s2699_s16), 1  ;;  %2874 = vmatpush3.bf16.msra.mxu0 %v3044_v1  ;;  %vm3130_vm2 = vmand %vm439_vm1, %vm440_vm0  ;;  %v3046_v26 = vld [vmem:[%s4678_s1 + $0x8] sm:$0xff]   ;;  %vm640_vm6 = vcmask 31744   ;;  %vm689_vm7 = vcmask 64512   ;;  %vm722_vm8 = vcmask 97280   ;;  %vm763_vm9 = vcmask 130048  }
  0x10   : > { %s2803_s20 = sshll.u32 %s4719_s16, 7  ;;  %vm3151_vm5 = vmand %vm506_vm3, %vm507_vm4  ;;  %2907 = vmatprep.subr.bf16.mxu1 %v3046_v26  ;;  %s3067_s10 = smov 16   ;;  %vm2578_vm10 = vcmask 195584   ;;  %vm2611_vm11 = vcmask 261120  }
  0x11   : > { %s3113_s23 = scalar_lea.vmem %s4677_s0, %s2803_s20  ;;  %2908 = vmatpush3.bf16.msra.mxu1 %v3046_v26  ;;  %s3068_s11 = smov 24  }
  0x12   : > { %v3116_v2 = vld [vmem:[%s3113_s23] sm:$0xff]   ;;  %v3119_v3 = vld [vmem:[%s3113_s23 + $0x8] sm:$0xff]   ;;  %v3149_v18 = vld [vmem:[%s3113_s23 + $0x10] sm:$0xff]   ;;  %s2804_s18 = sshll.u32 %s4719_s16, 8 }
  0x13   : > { %530 = vrot.lane.b32.xlu0 %v3116_v2, %s3064_s17  ;;  %v312_v4 = vshrl.u32 %v3116_v2, 16  ;;  %v315_v5 = vshll.u32 %v3116_v2, 16  ;;  %610 = vrot.lane.b32.xlu1 %v3119_v3, %s3065_s24  ;;  %v319_v6 = vshrl.u32 %v3119_v3, 16  ;;  %v322_v7 = vshll.u32 %v3119_v3, 16  ;;  %v3158_v21 = vld [vmem:[%s3113_s23 + $0x18] sm:$0xff]   ;;  %v3200_v39 = vld [vmem:[%s3113_s23 + $0x20] sm:$0xff]   ;;  %s4505_s21 = scalar_lea.vmem %s4681_s4, %s2804_s18 }
  0x14   : > { %v326_v23 = vshrl.u32 %v3149_v18, 16  ;;  %v329_v25 = vshll.u32 %v3149_v18, 16  ;;  %v333_v28 = vshrl.u32 %v3158_v21, 16  ;;  %v336_v31 = vshll.u32 %v3158_v21, 16  ;;  %v3207_v42 = vld [vmem:[%s3113_s23 + $0x28] sm:$0xff]   ;;  %v3242_v57 = vld [vmem:[%s3113_s23 + $0x30] sm:$0xff]  }
  0x15   : > { %v314_v8 = vrot.slane %v312_v4, 7  ;;  %v321_v10 = vrot.slane %v319_v6, 7  ;;  %v458_v12 = vrot.slane %v315_v5, 1  ;;  %v460_v14 = vrot.slane %v322_v7, 1  ;;  %v3249_v60 = vld [vmem:[%s3113_s23 + $0x38] sm:$0xff]  }
  0x16   : > { %v328_v27 = vrot.slane %v326_v23, 7  ;;  %v335_v30 = vrot.slane %v333_v28, 7  ;;  %v462_v34 = vrot.slane %v329_v25, 1  ;;  %v464_v37 = vrot.slane %v336_v31, 1 }
  0x17   : > { %608 = vrot.lane.b32.xlu0 %v3116_v2, %s3065_s24  ;;  %v317_v11 = vor.u32 %v315_v5, %v314_v8  ;;  %v324_v13 = vor.u32 %v322_v7, %v321_v10  ;;  %v459_v17 = vor.u32 %v458_v12, %v312_v4  ;;  %v461_v20 = vor.u32 %v460_v14, %v319_v6 }
  0x18   : > { %v331_v29 = vor.u32 %v329_v25, %v328_v27  ;;  %v338_v33 = vor.u32 %v336_v31, %v335_v30  ;;  %v463_v36 = vor.u32 %v462_v34, %v326_v23  ;;  %v465_v40 = vor.u32 %v464_v37, %v333_v28  ;;  %v3291_v23 = vld [vmem:[%s3113_s23 + $0x48] sm:$0xff]  }
  0x19   : > { %v3138_v15 = vsel %vm3130_vm2, 0, %v317_v11  ;;  %v3146_v16 = vsel %vm3130_vm2, 0, %v324_v13  ;;  %v509_v22 = vsel %vm3151_vm5, %v459_v17, 0  ;;  %v510_v24 = vsel %vm3151_vm5, %v461_v20, 0  ;;  %v3284_v17 = vld [vmem:[%s3113_s23 + $0x40] sm:$0xff]  }
  0x1a   : > { %576 = vrot.lane.b32.xlu1 %v3138_v15, %s3066_s25  ;;  %v3183_v32 = vsel %vm3130_vm2, 0, %v331_v29  ;;  %v3191_v35 = vsel %vm3130_vm2, 0, %v338_v33  ;;  %v511_v38 = vsel %vm3151_vm5, %v463_v36, 0  ;;  %v340_v41 = vshrl.u32 %v3200_v39, 16 }
  0x1b   : > { %1110 = vrot.lane.b32.xlu0 %v3116_v2, %s3066_s25  ;;  %v512_v43 = vsel %vm3151_vm5, %v465_v40, 0  ;;  %v343_v45 = vshll.u32 %v3200_v39, 16  ;;  %v347_v46 = vshrl.u32 %v3207_v42, 16  ;;  %v350_v49 = vshll.u32 %v3207_v42, 16 }
  0x1c   : > { %v342_v44 = vrot.slane %v340_v41, 7  ;;  %v354_v59 = vshrl.u32 %v3242_v57, 16  ;;  %v357_v63 = vshll.u32 %v3242_v57, 16  ;;  %v361_v1 = vshrl.u32 %v3249_v60, 16 }
  0x1d   : > { %v349_v48 = vrot.slane %v347_v46, 7  ;;  %v466_v52 = vrot.slane %v343_v45, 1  ;;  %v468_v55 = vrot.slane %v350_v49, 1  ;;  %v364_v6 = vshll.u32 %v3249_v60, 16 }
  0x1e   : > { %578 = vrot.lane.b32.xlu1 %v3146_v16, %s3066_s25  ;;  %v345_v47 = vor.u32 %v343_v45, %v342_v44  ;;  %v356_v62 = vrot.slane %v354_v59, 7  ;;  %v363_v5 = vrot.slane %v361_v1, 7  ;;  %v470_v10 = vrot.slane %v357_v63, 1 }
  0x1f   : > { %1112 = vrot.lane.b32.xlu0 %v3119_v3, %s3066_s25  ;;  %v352_v51 = vor.u32 %v350_v49, %v349_v48  ;;  %v467_v54 = vor.u32 %v466_v52, %v340_v41  ;;  %v469_v58 = vor.u32 %v468_v55, %v347_v46  ;;  %v472_v13 = vrot.slane %v364_v6, 1  ;;  %v3326_v41 = vld [vmem:[%s3113_s23 + $0x50] sm:$0xff]   ;;  %v3333_v46 = vld [vmem:[%s3113_s23 + $0x58] sm:$0xff]  }
  0x20   : > { %v3225_v50 = vsel %vm3130_vm2, 0, %v345_v47  ;;  %v359_v4 = vor.u32 %v357_v63, %v356_v62  ;;  %v366_v8 = vor.u32 %v364_v6, %v363_v5  ;;  %v471_v12 = vor.u32 %v470_v10, %v354_v59 }
  0x21   : > { %v3233_v53 = vsel %vm3130_vm2, 0, %v352_v51  ;;  %v513_v56 = vsel %vm3151_vm5, %v467_v54, 0  ;;  %v514_v61 = vsel %vm3151_vm5, %v469_v58, 0  ;;  %v473_v20 = vor.u32 %v472_v13, %v361_v1 }
  0x22   : > { %1080 = vrot.lane.b32.xlu1 %v509_v22, %s3064_s17  ;;  %v3267_v7 = vsel %vm3130_vm2, 0, %v359_v4  ;;  %v3275_v11 = vsel %vm3130_vm2, 0, %v366_v8  ;;  %v515_v14 = vsel %vm3151_vm5, %v471_v12, 0  ;;  %v371_v26 = vshll.u32 %v3284_v17, 16  ;;  %v3052_v12 = vld [vmem:[%s4678_s1 + $0x18] sm:$0xff]  }
  0x23   : > { %1145 = vrot.lane.b32.xlu0 %v510_v24, %s3065_s24  ;;  %v375_v27 = vshrl.u32 %v3291_v23, 16  ;;  %v378_v30 = vshll.u32 %v3291_v23, 16  ;;  %v382_v45 = vshrl.u32 %v3326_v41, 16  ;;  %v385_v49 = vshll.u32 %v3326_v41, 16  ;;  %2975 = vmatprep.subr.bf16.mxu1 %v3052_v12 }
  0x24   : > { %v474_v34 = vrot.slane %v371_v26, 1  ;;  %v389_v51 = vshrl.u32 %v3333_v46, 16  ;;  %v392_v58 = vshll.u32 %v3333_v46, 16 }
  0x25   : > { %v377_v29 = vrot.slane %v375_v27, 7  ;;  %v384_v48 = vrot.slane %v382_v45, 7  ;;  %v478_v1 = vrot.slane %v385_v49, 1 }
  0x26   : > { %1143 = vrot.lane.b32.xlu1 %v509_v22, %s3065_s24  ;;  %v368_v22 = vshrl.u32 %v3284_v17, 16 }
  0x27   : > { %534 = vrot.lane.b32.xlu0 %v3149_v18, %s3064_s17  ;;  %v380_v33 = vor.u32 %v378_v30, %v377_v29  ;;  %v387_v55 = vor.u32 %v385_v49, %v384_v48 }
  0x28   : > { %v370_v25 = vrot.slane %v368_v22, 7  ;;  %v475_v37 = vor.u32 %v474_v34, %v368_v22 }
  0x29   : > { %v3317_v36 = vsel %vm3130_vm2, 0, %v380_v33  ;;  %v3354_v62 = vsel %vm3130_vm2, 0, %v387_v55 }
  0x2a   : > { %532 = vrot.lane.b32.xlu1 %v3119_v3, %s3064_s17  ;;  %v373_v28 = vor.u32 %v371_v26, %v370_v25  ;;  %v517_v40 = vsel %vm3151_vm5, %v475_v37, 0 }
  0x2b   : > { %1082 = vrot.lane.b32.xlu0 %v510_v24, %s3064_s17  ;;  %v516_v24 = vsel %vm3151_vm5, %v473_v20, 0 }
  0x2c   : > { %v3309_v31 = vsel %vm3130_vm2, 0, %v373_v28  ;;  %v3386_v28 = vld [vmem:[%s3113_s23 + $0x60] sm:$0xff]  }
  0x2e   : > { %580 = vrot.lane.b32.xlu1 %v3183_v32, %s3066_s25 }
  0x2f   : > { %612 = vrot.lane.b32.xlu0 %v3149_v18, %s3065_s24 }
  0x32   : > { %582 = vrot.lane.b32.xlu1 %v3191_v35, %s3066_s25 }
  0x33   : > { %1114 = vrot.lane.b32.xlu0 %v3149_v18, %s3066_s25 }
  0x36   : > { %1084 = vrot.lane.b32.xlu1 %v511_v38, %s3064_s17 }
  0x37   : > { %1116 = vrot.lane.b32.xlu0 %v3158_v21, %s3066_s25 }
  0x3a   : > { %614 = vrot.lane.b32.xlu1 %v3158_v21, %s3065_s24 }
  0x3b   : > { %1149 = vrot.lane.b32.xlu0 %v512_v43, %s3065_s24 }
  0x3e   : > { %1147 = vrot.lane.b32.xlu1 %v511_v38, %s3065_s24  ;;  %v476_v38 = vrot.slane %v378_v30, 1 }
  0x3f   : > { %538 = vrot.lane.b32.xlu0 %v3200_v39, %s3064_s17 }
  0x42   : > { %536 = vrot.lane.b32.xlu1 %v3158_v21, %s3064_s17 }
  0x43   : > { %1086 = vrot.lane.b32.xlu0 %v512_v43, %s3064_s17  ;;  %v477_v43 = vor.u32 %v476_v38, %v375_v27  ;;  %v396_v38 = vshrl.u32 %v3386_v28, 16 }
  0x45   : > { %v518_v47 = vsel %vm3151_vm5, %v477_v43, 0  ;;  %v398_v49 = vrot.slane %v396_v38, 7 }
  0x46   : > { %584 = vrot.lane.b32.xlu1 %v3225_v50, %s3066_s25 }
  0x47   : > { %616 = vrot.lane.b32.xlu0 %v3200_v39, %s3065_s24 }
  0x4a   : > { %586 = vrot.lane.b32.xlu1 %v3233_v53, %s3066_s25 }
  0x4b   : > { %1118 = vrot.lane.b32.xlu0 %v3200_v39, %s3066_s25 }
  0x4e   : > { %1088 = vrot.lane.b32.xlu1 %v513_v56, %s3064_s17 }
  0x4f   : > { %1120 = vrot.lane.b32.xlu0 %v3207_v42, %s3066_s25 }
  0x52   : > { %618 = vrot.lane.b32.xlu1 %v3207_v42, %s3065_s24 }
  0x53   : > { %1153 = vrot.lane.b32.xlu0 %v514_v61, %s3065_s24 }
  0x56   : > { %1151 = vrot.lane.b32.xlu1 %v513_v56, %s3065_s24  ;;  %v391_v56 = vrot.slane %v389_v51, 7 }
  0x57   : > { %542 = vrot.lane.b32.xlu0 %v3242_v57, %s3064_s17 }
  0x58   : > { %v394_v63 = vor.u32 %v392_v58, %v391_v56 }
  0x5a   : > { %540 = vrot.lane.b32.xlu1 %v3207_v42, %s3064_s17  ;;  %v3369_v13 = vsel %vm3130_vm2, 0, %v394_v63 }
  0x5b   : > { %1090 = vrot.lane.b32.xlu0 %v514_v61, %s3064_s17  ;;  %v3051_v61 = vld [vmem:[%s4678_s1 + $0x10] sm:$0xff]  }
  0x5c   : > { %2941 = vmatprep.subr.bf16.mxu0 %v3051_v61 }
  0x5e   : > { %588 = vrot.lane.b32.xlu1 %v3267_v7, %s3066_s25 }
  0x5f   : > { %620 = vrot.lane.b32.xlu0 %v3242_v57, %s3065_s24 }
  0x62   : > { %590 = vrot.lane.b32.xlu1 %v3275_v11, %s3066_s25 }
  0x63   : > { %1122 = vrot.lane.b32.xlu0 %v3242_v57, %s3066_s25 }
  0x66   : > { %1092 = vrot.lane.b32.xlu1 %v515_v14, %s3064_s17 }
  0x67   : > { %1124 = vrot.lane.b32.xlu0 %v3249_v60, %s3066_s25 }
  0x6a   : > { %622 = vrot.lane.b32.xlu1 %v3249_v60, %s3065_s24 }
  0x6b   : > { %1157 = vrot.lane.b32.xlu0 %v516_v24, %s3065_s24 }
  0x6e   : > { %1155 = vrot.lane.b32.xlu1 %v515_v14, %s3065_s24  ;;  %v479_v14 = vor.u32 %v478_v1, %v382_v45 }
  0x6f   : > { %546 = vrot.lane.b32.xlu0 %v3284_v17, %s3064_s17 }
  0x72   : > { %544 = vrot.lane.b32.xlu1 %v3249_v60, %s3064_s17 }
  0x73   : > { %1094 = vrot.lane.b32.xlu0 %v516_v24, %s3064_s17  ;;  %v480_v24 = vrot.slane %v392_v58, 1 }
  0x75   : > { %v481_v30 = vor.u32 %v480_v24, %v389_v51  ;;  %v399_v51 = vshll.u32 %v3386_v28, 16 }
  0x76   : > { %592 = vrot.lane.b32.xlu1 %v3309_v31, %s3066_s25 }
  0x77   : > { %624 = vrot.lane.b32.xlu0 %v3284_v17, %s3065_s24  ;;  %v520_v45 = vsel %vm3151_vm5, %v481_v30, 0  ;;  %v401_v56 = vor.u32 %v399_v51, %v398_v49 }
  0x7a   : > { %594 = vrot.lane.b32.xlu1 %v3317_v36, %s3066_s25 }
  0x7b   : > { %1126 = vrot.lane.b32.xlu0 %v3284_v17, %s3066_s25 }
  0x7e   : > { %1096 = vrot.lane.b32.xlu1 %v517_v40, %s3064_s17 }
  0x7f   : > { %1128 = vrot.lane.b32.xlu0 %v3291_v23, %s3066_s25 }
  0x80   : > { %v529_v44 = vpop.permute.xlu0 %528 }
  0x81   : > { %v643_v4 = vsel %vm640_vm6, 0, %v529_v44 }
  0x82   : > { %626 = vrot.lane.b32.xlu1 %v3291_v23, %s3065_s24 }
  0x83   : > { %1161 = vrot.lane.b32.xlu0 %v518_v47, %s3065_s24 }
  0x85   : > { %v531_v52 = vpop.permute.xlu0 %530  ;;  %v611_v54 = vpop.permute.xlu1 %610 }
  0x86   : > { %1159 = vrot.lane.b32.xlu1 %v517_v40, %s3065_s24  ;;  %v646_v20 = vsel %vm640_vm6, %v3138_v15, %v531_v52  ;;  %v519_v15 = vsel %vm3151_vm5, %v479_v14, 0  ;;  %v3396_v40 = vld [vmem:[%s3113_s23 + $0x68] sm:$0xff]  }
  0x87   : > { %550 = vrot.lane.b32.xlu0 %v3326_v41, %s3064_s17  ;;  %v403_v52 = vshrl.u32 %v3396_v40, 16 }
  0x89   : > { %v609_v59 = vpop.permute.xlu0 %608  ;;  %v405_v58 = vrot.slane %v403_v52, 7 }
  0x8a   : > { %548 = vrot.lane.b32.xlu1 %v3291_v23, %s3064_s17 }
  0x8b   : > { %1098 = vrot.lane.b32.xlu0 %v518_v47, %s3064_s17 }
  0x8c   : > { %v577_v5 = vpop.permute.xlu1 %576 }
  0x8d   : > { %v691_v6 = vsel %vm689_vm7, %v643_v4, %v577_v5  ;;  %v1111_v8 = vpop.permute.xlu0 %1110 }
  0x8e   : > { %596 = vrot.lane.b32.xlu1 %v3354_v62, %s3066_s25  ;;  %v724_v10 = vsel %vm722_vm8, %v691_v6, %v609_v59  ;;  %v1206_v43 = vsel %vm689_vm7, %v643_v4, %v1111_v8  ;;  %v406_v59 = vshll.u32 %v3396_v40, 16  ;;  %v3430_v6 = vsel %vm3130_vm2, 0, %v401_v56 }
  0x8f   : > { %628 = vrot.lane.b32.xlu0 %v3326_v41, %s3065_s24  ;;  %2875 = vmatprep.mubr.msk.bf16.mxu0 %vm763_vm9, %v724_v10  ;;  %v482_v8 = vrot.slane %v399_v51, 1 }
  0x90   : > { %v579_v22 = vpop.permute.xlu1 %578  ;;  %v484_v24 = vrot.slane %v406_v59, 1 }
  0x91   : > { %v693_v25 = vsel %vm689_vm7, %v646_v20, %v579_v22  ;;  %v1113_v26 = vpop.permute.xlu0 %1112  ;;  %v483_v20 = vor.u32 %v482_v8, %v396_v38 }
  0x92   : > { %598 = vrot.lane.b32.xlu1 %v3369_v13, %s3066_s25  ;;  %v3377_v27 = vsel %vm722_vm8, %v693_v25, %v611_v54 }
  0x93   : > { %1130 = vrot.lane.b32.xlu0 %v3326_v41, %s3066_s25  ;;  %2876 = vmatmul.mubr.msk.bf16.vlgmr.msra.gmra.mrb[0].mxu0 %vm763_vm9, %v3377_v27 }
  0x94   : > { %v1081_v29 = vpop.permute.xlu1 %1080  ;;  %2942 = vmatpush3.bf16.msra.mxu0 %v3051_v61 }
  0x95   : > { %v1176_v33 = vsel %vm640_vm6, %v3116_v2, %v1081_v29  ;;  %v1146_v34 = vpop.permute.xlu0 %1145  ;;  %v3449_v29 = vld [vmem:[%s3113_s23 + $0x70] sm:$0xff]  }
  0x96   : > { %1100 = vrot.lane.b32.xlu1 %v519_v15, %s3064_s17  ;;  %v1208_v37 = vsel %vm689_vm7, %v1176_v33, %v1113_v26 }
  0x97   : > { %1132 = vrot.lane.b32.xlu0 %v3333_v46, %s3066_s25  ;;  %v3403_v48 = vsel %vm722_vm8, %v1208_v37, %v1146_v34  ;;  %v485_v34 = vor.u32 %v484_v24, %v403_v52 }
  0x98   : > { %v1144_v44 = vpop.permute.xlu1 %1143 }
  0x99   : > { %v535_v47 = vpop.permute.xlu0 %534  ;;  %v1238_v2 = vsel %vm722_vm8, %v1206_v43, %v1144_v44  ;;  %v410_v44 = vshrl.u32 %v3449_v29, 16 }
  0x9a   : > { %630 = vrot.lane.b32.xlu1 %v3333_v46, %s3065_s24  ;;  %2909 = vmatprep.mubr.msk.bf16.mxu1 %vm763_vm9, %v1238_v2  ;;  %v652_v26 = vsel %vm640_vm6, %v3183_v32, %v535_v47 }
  0x9b   : > { %1165 = vrot.lane.b32.xlu0 %v520_v45, %s3065_s24  ;;  %2910 = vmatmul.mubr.msk.bf16.vlgmr.msra.gmra.mrb[0].mxu1 %vm763_vm9, %v3403_v48 }
  0x9c   : > { %v533_v54 = vpop.permute.xlu1 %532  ;;  %2976 = vmatpush3.bf16.msra.mxu1 %v3052_v12 }
  0x9d   : > { %v1083_v55 = vpop.permute.xlu0 %1082  ;;  %v649_v61 = vsel %vm640_vm6, %v3146_v16, %v533_v54  ;;  %v408_v16 = vor.u32 %v406_v59, %v405_v58  ;;  %v412_v54 = vrot.slane %v410_v44, 7 }
  0x9e   : > { %1163 = vrot.lane.b32.xlu1 %v519_v15, %s3065_s24  ;;  %v521_v15 = vsel %vm3151_vm5, %v483_v20, 0  ;;  %v1178_v32 = vsel %vm640_vm6, %v3119_v3, %v1083_v55  ;;  %v413_v55 = vshll.u32 %v3449_v29, 16 }
  0x9f   : > { %554 = vrot.lane.b32.xlu0 %v3386_v28, %s3064_s17  ;;  %v3438_v14 = vsel %vm3130_vm2, 0, %v408_v16 }
  0xa0   : > { %v581_v63 = vpop.permute.xlu1 %580 }
  0xa1   : > { %v695_v1 = vsel %vm689_vm7, %v649_v61, %v581_v63  ;;  %v613_v4 = vpop.permute.xlu0 %612  ;;  %v415_v61 = vor.u32 %v413_v55, %v412_v54 }
  0xa2   : > { %v3421_v5 = vsel %vm722_vm8, %v695_v1, %v613_v4  ;;  %552 = vrot.lane.b32.xlu1 %v3333_v46, %s3064_s17 }
  0xa3   : > { %1102 = vrot.lane.b32.xlu0 %v520_v45, %s3064_s17  ;;  %2879 = vmatprep.mubr.msk.bf16.mxu0 %vm763_vm9, %v3421_v5  ;;  %v3466_v45 = vld [vmem:[%s3113_s23 + $0x78] sm:$0xff]   ;;  %v3504_v20 = vsel %vm3130_vm2, 0, %v415_v61 }
  0xa4   : > { %v583_v10 = vpop.permute.xlu1 %582  ;;  %v417_v56 = vshrl.u32 %v3466_v45, 16  ;;  %v420_v1 = vshll.u32 %v3466_v45, 16 }
  0xa5   : > { %v1115_v12 = vpop.permute.xlu0 %1114  ;;  %v697_v30 = vsel %vm689_vm7, %v652_v26, %v583_v10 }
  0xa6   : > { %600 = vrot.lane.b32.xlu1 %v3430_v6, %s3066_s25  ;;  %v1210_v47 = vsel %vm689_vm7, %v1178_v32, %v1115_v12  ;;  %v419_v63 = vrot.slane %v417_v56, 7 }
  0xa7   : > { %632 = vrot.lane.b32.xlu0 %v3386_v28, %s3065_s24 }
  0xa8   : > { %v1085_v22 = vpop.permute.xlu1 %1084 }
  0xa9   : > { %v1117_v25 = vpop.permute.xlu0 %1116  ;;  %v1180_v43 = vsel %vm640_vm6, %v3149_v18, %v1085_v22  ;;  %v522_v18 = vsel %vm3151_vm5, %v485_v34, 0  ;;  %v486_v22 = vrot.slane %v413_v55, 1 }
  0xaa   : > { %602 = vrot.lane.b32.xlu1 %v3438_v14, %s3066_s25  ;;  %v1212_v49 = vsel %vm689_vm7, %v1180_v43, %v1117_v25 }
  0xab   : > { %1134 = vrot.lane.b32.xlu0 %v3386_v28, %s3066_s25 }
  0xac   : > { %v615_v33 = vpop.permute.xlu1 %614 }
  0xad   : > { %v3453_v37 = vsel %vm722_vm8, %v697_v30, %v615_v33  ;;  %v1150_v38 = vpop.permute.xlu0 %1149  ;;  %v488_v33 = vrot.slane %v420_v1, 1 }
  0xae   : > { %1104 = vrot.lane.b32.xlu1 %v521_v15, %s3064_s17  ;;  %2880 = vmatmul.mubr.msk.bf16.gmra.mrb[4].mxu0 %vm763_vm9, %v3453_v37  ;;  %v3476_v3 = vsel %vm722_vm8, %v1212_v49, %v1150_v38  ;;  %v2762_v49 = vcombine.low %v3063_v0, %v3063_v0 }
  0xaf   : > { %1136 = vrot.lane.b32.xlu0 %v3396_v40, %s3066_s25 }
  0xb0   : > { %v1148_v2 = vpop.permute.xlu1 %1147  ;;  %v3028_v61 = vpack.i.bf16 %v3063_v0, %v2762_v49 }
  0xb1   : > { %v3473_v51 = vsel %vm722_vm8, %v1210_v47, %v1148_v2  ;;  %v539_v52 = vpop.permute.xlu0 %538  ;;  %v489_v47 = vor.u32 %v488_v33, %v417_v56 }
  0xb2   : > { %634 = vrot.lane.b32.xlu1 %v3396_v40, %s3065_s24  ;;  %2913 = vmatprep.mubr.msk.bf16.mxu1 %vm763_vm9, %v3473_v51  ;;  %v658_v38 = vsel %vm640_vm6, %v3225_v50, %v539_v52 }
  0xb3   : > { %1169 = vrot.lane.b32.xlu0 %v522_v18, %s3065_s24  ;;  %2914 = vmatmul.mubr.msk.bf16.gmra.mrb[4].mxu1 %vm763_vm9, %v3476_v3 }
  0xb4   : > { %v537_v58 = vpop.permute.xlu1 %536 }
  0xb5   : > { %v1087_v59 = vpop.permute.xlu0 %1086  ;;  %v655_v4 = vsel %vm640_vm6, %v3191_v35, %v537_v58  ;;  %v422_v35 = vor.u32 %v420_v1, %v419_v63 }
  0xb6   : > { %1167 = vrot.lane.b32.xlu1 %v521_v15, %s3065_s24  ;;  %v487_v15 = vor.u32 %v486_v22, %v410_v44  ;;  %v1182_v50 = vsel %vm640_vm6, %v3158_v21, %v1087_v59 }
  0xb7   : > { %558 = vrot.lane.b32.xlu0 %v3449_v29, %s3064_s17  ;;  %v3512_v26 = vsel %vm3130_vm2, 0, %v422_v35 }
  0xb8   : > { %v585_v16 = vpop.permute.xlu1 %584  ;;  %v523_v43 = vsel %vm3151_vm5, %v487_v15, 0 }
  0xb9   : > { %v699_v8 = vsel %vm689_vm7, %v655_v4, %v585_v16  ;;  %v617_v10 = vpop.permute.xlu0 %616 }
  0xba   : > { %v3495_v12 = vsel %vm722_vm8, %v699_v8, %v617_v10  ;;  %556 = vrot.lane.b32.xlu1 %v3396_v40, %s3064_s17 }
  0xbb   : > { %1106 = vrot.lane.b32.xlu0 %v522_v18, %s3064_s17  ;;  %2883 = vmatprep.mubr.msk.bf16.mxu0 %vm763_vm9, %v3495_v12 }
  0xbc   : > { %v587_v24 = vpop.permute.xlu1 %586 }
  0xbd   : > { %v1119_v25 = vpop.permute.xlu0 %1118  ;;  %v701_v9 = vsel %vm689_vm7, %v658_v38, %v587_v24 }
  0xbe   : > { %604 = vrot.lane.b32.xlu1 %v3504_v20, %s3066_s25  ;;  %v1214_v52 = vsel %vm689_vm7, %v1182_v50, %v1119_v25 }
  0xbf   : > { %636 = vrot.lane.b32.xlu0 %v3449_v29, %s3065_s24 }
  0xc0   : > { %v1089_v30 = vpop.permute.xlu1 %1088 }
  0xc1   : > { %v1121_v34 = vpop.permute.xlu0 %1120  ;;  %v1184_v18 = vsel %vm640_vm6, %v3200_v39, %v1089_v30  ;;  %v524_v39 = vsel %vm3151_vm5, %v489_v47, 0 }
  0xc2   : > { %606 = vrot.lane.b32.xlu1 %v3512_v26, %s3066_s25  ;;  %v1216_v55 = vsel %vm689_vm7, %v1184_v18, %v1121_v34 }
  0xc3   : > { %1138 = vrot.lane.b32.xlu0 %v3449_v29, %s3066_s25 }
  0xc4   : > { %v619_v32 = vpop.permute.xlu1 %618 }
  0xc5   : > { %v3524_v44 = vsel %vm722_vm8, %v701_v9, %v619_v32  ;;  %v1154_v2 = vpop.permute.xlu0 %1153 }
  0xc6   : > { %1108 = vrot.lane.b32.xlu1 %v523_v43, %s3064_s17  ;;  %2884 = vmatmul.mubr.msk.bf16.gmra.mrb[8].mxu0 %vm763_vm9, %v3524_v44  ;;  %v3545_v21 = vsel %vm722_vm8, %v1216_v55, %v1154_v2 }
  0xc7   : > { %1140 = vrot.lane.b32.xlu0 %v3466_v45, %s3066_s25 }
  0xc8   : > { %v1152_v54 = vpop.permute.xlu1 %1151 }
  0xc9   : > { %v3542_v56 = vsel %vm722_vm8, %v1214_v52, %v1152_v54  ;;  %v543_v58 = vpop.permute.xlu0 %542 }
  0xca   : > { %638 = vrot.lane.b32.xlu1 %v3466_v45, %s3065_s24  ;;  %2917 = vmatprep.mubr.msk.bf16.mxu1 %vm763_vm9, %v3542_v56  ;;  %v664_v22 = vsel %vm640_vm6, %v3267_v7, %v543_v58 }
  0xcb   : > { %1173 = vrot.lane.b32.xlu0 %v524_v39, %s3065_s24  ;;  %2918 = vmatmul.mubr.msk.bf16.gmra.mrb[8].mxu1 %vm763_vm9, %v3545_v21 }
  0xcc   : > { %v541_v19 = vpop.permute.xlu1 %540 }
  0xcd   : > { %v1091_v59 = vpop.permute.xlu0 %1090  ;;  %v661_v63 = vsel %vm640_vm6, %v3233_v53, %v541_v19 }
  0xce   : > { %1171 = vrot.lane.b32.xlu1 %v523_v43, %s3065_s24  ;;  %v1186_v34 = vsel %vm640_vm6, %v3207_v42, %v1091_v59 }
  0xcf   : > { %3024 = vrot.lane.b32.xlu0 %v2762_v49, %s3066_s25 }
  0xd0   : > { %v589_v1 = vpop.permute.xlu1 %588 }
  0xd1   : > { %v703_v4 = vsel %vm689_vm7, %v661_v63, %v589_v1  ;;  %v621_v16 = vpop.permute.xlu0 %620 }
  0xd2   : > { %v3561_v8 = vsel %vm722_vm8, %v703_v4, %v621_v16  ;;  %1567 = vrot.lane.b32.xlu1 %v3466_v45, %s3064_s17 }
  0xd3   : > { %2887 = vmatprep.mubr.msk.bf16.mxu0 %vm763_vm9, %v3561_v8  ;;  %3029 = vrot.lane.b32.xlu0 %v3028_v61, %s3065_s24 }
  0xd4   : > { %v591_v10 = vpop.permute.xlu1 %590 }
  0xd5   : > { %v1123_v0 = vpop.permute.xlu0 %1122  ;;  %v705_v24 = vsel %vm689_vm7, %v664_v22, %v591_v10 }
  0xd6   : > { %1850 = vrot.lane.b32.xlu1 %v524_v39, %s3064_s17  ;;  %v1218_v38 = vsel %vm689_vm7, %v1186_v34, %v1123_v0 }
  0xd8   : > { %v1093_v53 = vpop.permute.xlu1 %1092 }
  0xd9   : > { %v1125_v35 = vpop.permute.xlu0 %1124  ;;  %v1188_v33 = vsel %vm640_vm6, %v3242_v57, %v1093_v53 }
  0xda   : > { %v1220_v7 = vsel %vm689_vm7, %v1188_v33, %v1125_v35 }
  0xdc   : > { %v623_v25 = vpop.permute.xlu1 %622 }
  0xdd   : > { %v3573_v15 = vsel %vm722_vm8, %v705_v24, %v623_v25  ;;  %v1158_v30 = vpop.permute.xlu0 %1157 }
  0xde   : > { %2888 = vmatmul.mubr.msk.bf16.gmra.mrb[12].mxu0 %vm763_vm9, %v3573_v15  ;;  %v3587_v47 = vsel %vm722_vm8, %v1220_v7, %v1158_v30 }
  0xe0   : > { %v1156_v43 = vpop.permute.xlu1 %1155 }
  0xe1   : > { %v3584_v9 = vsel %vm722_vm8, %v1218_v38, %v1156_v43  ;;  %v547_v32 = vpop.permute.xlu0 %546 }
  0xe2   : > { %2921 = vmatprep.mubr.msk.bf16.mxu1 %vm763_vm9, %v3584_v9  ;;  %v670_v19 = vsel %vm640_vm6, %v3309_v31, %v547_v32 }
  0xe3   : > { %2922 = vmatmul.mubr.msk.bf16.gmra.mrb[12].mxu1 %vm763_vm9, %v3587_v47 }
  0xe4   : > { %v545_v57 = vpop.permute.xlu1 %544 }
  0xe5   : > { %v1095_v42 = vpop.permute.xlu0 %1094  ;;  %v667_v2 = vsel %vm640_vm6, %v3275_v11, %v545_v57 }
  0xe6   : > { %v1190_v4 = vsel %vm640_vm6, %v3249_v60, %v1095_v42 }
  0xe8   : > { %v593_v18 = vpop.permute.xlu1 %592 }
  0xe9   : > { %v707_v50 = vsel %vm689_vm7, %v667_v2, %v593_v18  ;;  %v625_v49 = vpop.permute.xlu0 %624 }
  0xea   : > { %v3597_v52 = vsel %vm722_vm8, %v707_v50, %v625_v49 }
  0xeb   : > { %2891 = vmatprep.mubr.msk.bf16.mxu0 %vm763_vm9, %v3597_v52 }
  0xec   : > { %v595_v54 = vpop.permute.xlu1 %594 }
  0xed   : > { %v1127_v39 = vpop.permute.xlu0 %1126  ;;  %v709_v59 = vsel %vm689_vm7, %v670_v19, %v595_v54 }
  0xee   : > { %v1222_v16 = vsel %vm689_vm7, %v1190_v4, %v1127_v39 }
  0xf0   : > { %v1097_v55 = vpop.permute.xlu1 %1096 }
  0xf1   : > { %v1129_v58 = vpop.permute.xlu0 %1128  ;;  %v1192_v1 = vsel %vm640_vm6, %v3284_v17, %v1097_v55 }
  0xf2   : > { %v1224_v31 = vsel %vm689_vm7, %v1192_v1, %v1129_v58 }
  0xf4   : > { %v627_v11 = vpop.permute.xlu1 %626 }
  0xf5   : > { %v3605_v61 = vsel %vm722_vm8, %v709_v59, %v627_v11  ;;  %v1162_v63 = vpop.permute.xlu0 %1161 }
  0xf6   : > { %2892 = vmatmul.mubr.msk.bf16.gmra.mrb[16].mxu0 %vm763_vm9, %v3605_v61  ;;  %v3619_v35 = vsel %vm722_vm8, %v1224_v31, %v1162_v63 }
  0xf8   : > { %v1160_v10 = vpop.permute.xlu1 %1159 }
  0xf9   : > { %v3616_v0 = vsel %vm722_vm8, %v1222_v16, %v1160_v10  ;;  %v551_v53 = vpop.permute.xlu0 %550 }
  0xfa   : > { %2925 = vmatprep.mubr.msk.bf16.mxu1 %vm763_vm9, %v3616_v0  ;;  %v676_v32 = vsel %vm640_vm6, %v3354_v62, %v551_v53 }
  0xfb   : > { %2926 = vmatmul.mubr.msk.bf16.gmra.mrb[16].mxu1 %vm763_vm9, %v3619_v35 }
  0xfc   : > { %v549_v17 = vpop.permute.xlu1 %548 }
  0xfd   : > { %v1099_v60 = vpop.permute.xlu0 %1098  ;;  %v673_v22 = vsel %vm640_vm6, %v3317_v36, %v549_v17 }
  0xfe   : > { %v1194_v50 = vsel %vm640_vm6, %v3291_v23, %v1099_v60 }
 0x100   : > { %v597_v24 = vpop.permute.xlu1 %596 }
 0x101   : > { %v711_v25 = vsel %vm689_vm7, %v673_v22, %v597_v24  ;;  %v629_v30 = vpop.permute.xlu0 %628 }
 0x102   : > { %v3629_v33 = vsel %vm722_vm8, %v711_v25, %v629_v30 }
 0x103   : > { %2895 = vmatprep.mubr.msk.bf16.mxu0 %vm763_vm9, %v3629_v33 }
 0x104   : > { %v599_v34 = vpop.permute.xlu1 %598 }
 0x105   : > { %v1131_v38 = vpop.permute.xlu0 %1130  ;;  %v713_v57 = vsel %vm689_vm7, %v676_v32, %v599_v34 }
 0x106   : > { %v1226_v49 = vsel %vm689_vm7, %v1194_v50, %v1131_v38 }
 0x108   : > { %v1101_v43 = vpop.permute.xlu1 %1100 }
 0x109   : > { %v1133_v7 = vpop.permute.xlu0 %1132  ;;  %v1196_v18 = vsel %vm640_vm6, %v3326_v41, %v1101_v43 }
 0x10a   : > { %v1228_v62 = vsel %vm689_vm7, %v1196_v18, %v1133_v7 }
 0x10c   : > { %v631_v36 = vpop.permute.xlu1 %630 }
 0x10d   : > { %v3637_v42 = vsel %vm722_vm8, %v713_v57, %v631_v36  ;;  %v1166_v2 = vpop.permute.xlu0 %1165 }
 0x10e   : > { %2896 = vmatmul.mubr.msk.bf16.gmra.mrb[20].mxu0 %vm763_vm9, %v3637_v42  ;;  %v3651_v58 = vsel %vm722_vm8, %v1228_v62, %v1166_v2 }
 0x110   : > { %v1164_v54 = vpop.permute.xlu1 %1163 }
 0x111   : > { %v3648_v39 = vsel %vm722_vm8, %v1226_v49, %v1164_v54  ;;  %v555_v55 = vpop.permute.xlu0 %554 }
 0x112   : > { %2929 = vmatprep.mubr.msk.bf16.mxu1 %vm763_vm9, %v3648_v39  ;;  %v682_v53 = vsel %vm640_vm6, %v3430_v6, %v555_v55 }
 0x113   : > { %2930 = vmatmul.mubr.msk.bf16.gmra.mrb[20].mxu1 %vm763_vm9, %v3651_v58 }
 0x114   : > { %v553_v41 = vpop.permute.xlu1 %552 }
 0x115   : > { %v1103_v23 = vpop.permute.xlu0 %1102  ;;  %v679_v19 = vsel %vm640_vm6, %v3369_v13, %v553_v41 }
 0x116   : > { %v1198_v25 = vsel %vm640_vm6, %v3333_v46, %v1103_v23 }
 0x118   : > { %v601_v59 = vpop.permute.xlu1 %600 }
 0x119   : > { %v715_v11 = vsel %vm689_vm7, %v679_v19, %v601_v59  ;;  %v633_v63 = vpop.permute.xlu0 %632 }
 0x11a   : > { %v3661_v1 = vsel %vm722_vm8, %v715_v11, %v633_v63 }
 0x11b   : > { %2899 = vmatprep.mubr.msk.bf16.mxu0 %vm763_vm9, %v3661_v1 }
 0x11c   : > { %v603_v4 = vpop.permute.xlu1 %602 }
 0x11d   : > { %v1135_v16 = vpop.permute.xlu0 %1134  ;;  %v717_v17 = vsel %vm689_vm7, %v682_v53, %v603_v4 }
 0x11e   : > { %v1230_v30 = vsel %vm689_vm7, %v1198_v25, %v1135_v16 }
 0x120   : > { %v1105_v10 = vpop.permute.xlu1 %1104 }
 0x121   : > { %v1137_v31 = vpop.permute.xlu0 %1136  ;;  %v1200_v24 = vsel %vm640_vm6, %v3386_v28, %v1105_v10 }
 0x122   : > { %v1232_v6 = vsel %vm689_vm7, %v1200_v24, %v1137_v31 }
 0x124   : > { %v635_v13 = vpop.permute.xlu1 %634 }
 0x125   : > { %v3669_v60 = vsel %vm722_vm8, %v717_v17, %v635_v13  ;;  %v1170_v22 = vpop.permute.xlu0 %1169 }
 0x126   : > { %2900 = vmatmul.mubr.msk.bf16.gmra.mrb[24].mxu0 %vm763_vm9, %v3669_v60  ;;  %v3683_v7 = vsel %vm722_vm8, %v1232_v6, %v1170_v22 }
 0x128   : > { %v1168_v34 = vpop.permute.xlu1 %1167 }
 0x129   : > { %v3680_v38 = vsel %vm722_vm8, %v1230_v30, %v1168_v34  ;;  %v559_v43 = vpop.permute.xlu0 %558 }
 0x12a   : > { %2933 = vmatprep.mubr.msk.bf16.mxu1 %vm763_vm9, %v3680_v38  ;;  %v688_v55 = vsel %vm640_vm6, %v3504_v20, %v559_v43 }
 0x12b   : > { %2934 = vmatmul.mubr.msk.bf16.gmra.mrb[24].mxu1 %vm763_vm9, %v3683_v7 }
 0x12c   : > { %v557_v28 = vpop.permute.xlu1 %556 }
 0x12d   : > { %v1107_v46 = vpop.permute.xlu0 %1106  ;;  %v685_v32 = vsel %vm640_vm6, %v3438_v14, %v557_v28 }
 0x12e   : > { %v1202_v59 = vsel %vm640_vm6, %v3396_v40, %v1107_v46 }
 0x130   : > { %v605_v57 = vpop.permute.xlu1 %604 }
 0x131   : > { %v719_v36 = vsel %vm689_vm7, %v685_v32, %v605_v57  ;;  %v637_v2 = vpop.permute.xlu0 %636 }
 0x132   : > { %v3693_v18 = vsel %vm722_vm8, %v719_v36, %v637_v2 }
 0x133   : > { %2903 = vmatprep.mubr.msk.bf16.mxu0 %vm763_vm9, %v3693_v18 }
 0x134   : > { %v607_v50 = vpop.permute.xlu1 %606 }
 0x135   : > { %v1139_v49 = vpop.permute.xlu0 %1138  ;;  %v721_v41 = vsel %vm689_vm7, %v688_v55, %v607_v50 }
 0x136   : > { %v1234_v20 = vsel %vm689_vm7, %v1202_v59, %v1139_v49 }
 0x138   : > { %v1109_v54 = vpop.permute.xlu1 %1108 }
 0x139   : > { %v1141_v62 = vpop.permute.xlu0 %1140  ;;  %v1204_v19 = vsel %vm640_vm6, %v3449_v29, %v1109_v54 }
 0x13a   : > { %v1236_v4 = vsel %vm689_vm7, %v1204_v19, %v1141_v62 }
 0x13c   : > { %v639_v14 = vpop.permute.xlu1 %638 }
 0x13d   : > { %v3701_v23 = vsel %vm722_vm8, %v721_v41, %v639_v14  ;;  %v1174_v11 = vpop.permute.xlu0 %1173 }
 0x13e   : > { %2904 = vmatmul.mubr.msk.bf16.gmra.mrb[28].mxu0 %vm763_vm9, %v3701_v23  ;;  %v3717_v29 = vsel %vm722_vm8, %v1236_v4, %v1174_v11 }
 0x13f   : > { %2943 = vmatprep.mubr.msk.bf16.mxu0 %vm763_vm9, %v3377_v27 }
 0x140   : > { %v1172_v63 = vpop.permute.xlu1 %1171 }
 0x141   : > { %v3714_v16 = vsel %vm722_vm8, %v1234_v20, %v1172_v63 }
 0x142   : > { %2937 = vmatprep.mubr.msk.bf16.mxu1 %vm763_vm9, %v3714_v16 }
 0x143   : > { %2938 = vmatmul.mubr.msk.bf16.gmra.mrb[28].mxu1 %vm763_vm9, %v3717_v29 }
 0x144   : > { %2977 = vmatprep.mubr.msk.bf16.mxu1 %vm763_vm9, %v3403_v48 }
 0x146   : > { %2944 = vmatmul.mubr.msk.bf16.vlgmr.msra.gmra.mrb[32].mxu0 %vm763_vm9, %v3421_v5 }
 0x147   : > { %2947 = vmatprep.mubr.msk.bf16.mxu0 %vm763_vm9, %v3453_v37  ;;  %v3776_v37 = vld [vmem:[%s4679_s2] ss:$0 sm:$0xff] }
 0x14b   : > { %2978 = vmatmul.mubr.msk.bf16.vlgmr.msra.gmra.mrb[32].mxu1 %vm763_vm9, %v3473_v51 }
 0x14c   : > { %2981 = vmatprep.mubr.msk.bf16.mxu1 %vm763_vm9, %v3476_v3  ;;  %v3025_v3 = vpop.permute.xlu0 %3024 }
 0x14d   : > { %v3027_v22 = vunpack.i.h.bf16 %v3025_v3 }
 0x14e   : > { %2948 = vmatmul.mubr.msk.bf16.gmra.mrb[36].mxu0 %vm763_vm9, %v3495_v12 }
 0x14f   : > { %2951 = vmatprep.mubr.msk.bf16.mxu0 %vm763_vm9, %v3524_v44 }
 0x153   : > { %2982 = vmatmul.mubr.msk.bf16.gmra.mrb[36].mxu1 %vm763_vm9, %v3542_v56  ;;  %v3786_v56 = vld [vmem:[%s4680_s3] ss:$0 sm:$0xff] }
 0x154   : > { %2985 = vmatprep.mubr.msk.bf16.mxu1 %vm763_vm9, %v3545_v21 }
 0x156   : > { %2952 = vmatmul.mubr.msk.bf16.gmra.mrb[40].mxu0 %vm763_vm9, %v3561_v8 }
 0x157   : > { %2955 = vmatprep.mubr.msk.bf16.mxu0 %vm763_vm9, %v3573_v15 }
 0x15b   : > { %2986 = vmatmul.mubr.msk.bf16.gmra.mrb[40].mxu1 %vm763_vm9, %v3584_v9 }
 0x15c   : > { %2989 = vmatprep.mubr.msk.bf16.mxu1 %vm763_vm9, %v3587_v47 }
 0x15e   : > { %2956 = vmatmul.mubr.msk.bf16.gmra.mrb[44].mxu0 %vm763_vm9, %v3597_v52  ;;  %v1568_v52 = vpop.permute.xlu1 %1567 }
 0x15f   : > { %2959 = vmatprep.mubr.msk.bf16.mxu0 %vm763_vm9, %v3605_v61  ;;  %v1577_v10 = vsel %vm640_vm6, %v3512_v26, %v1568_v52 }
 0x162   : > { %v1851_v17 = vpop.permute.xlu1 %1850 }
 0x163   : > { %2990 = vmatmul.mubr.msk.bf16.gmra.mrb[44].mxu1 %vm763_vm9, %v3616_v0  ;;  %v1857_v26 = vsel %vm640_vm6, %v3466_v45, %v1851_v17 }
 0x164   : > { %2993 = vmatprep.mubr.msk.bf16.mxu1 %vm763_vm9, %v3619_v35  ;;  %v1859_v30 = vsel %vm689_vm7, %v1857_v26, %v3027_v22 }
 0x166   : > { %v3757_v27 = vpop.f32.mrb[0].mxu0  ;;  %2960 = vmatmul.mubr.msk.bf16.gmra.mrb[48].mxu0 %vm763_vm9, %v3629_v33 }
 0x167   : > { %v3761_v40 = vpop.f32.mrb[1].mxu0  ;;  %2963 = vmatprep.mubr.msk.bf16.mxu0 %vm763_vm9, %v3637_v42  ;;  %v3026_v42 = vunpack.i.l.bf16 %v3025_v3 }
 0x168   : > { %v3765_v48 = vpop.f32.mrb[2].mxu0 }
 0x169   : > { %v3767_v5 = vpop.f32.mrb[3].mxu0  ;;  %v1579_v13 = vsel %vm689_vm7, %v1577_v10, %v3026_v42 }
 0x16b   : > { %2994 = vmatmul.mubr.msk.bf16.gmra.mrb[48].mxu1 %vm763_vm9, %v3648_v39  ;;  %v3030_v39 = vpop.permute.xlu0 %3029 }
 0x16c   : > { %2997 = vmatprep.mubr.msk.bf16.mxu1 %vm763_vm9, %v3651_v58  ;;  %v3031_v53 = vunpack.i.l.bf16 %v3030_v39  ;;  %v3032_v25 = vunpack.i.h.bf16 %v3030_v39 }
 0x16e   : > { %v2911_v51 = vpop.f32.mrb[0].mxu1  ;;  %2964 = vmatmul.mubr.msk.bf16.gmra.mrb[52].mxu0 %vm763_vm9, %v3661_v1  ;;  %v1581_v24 = vsel %vm722_vm8, %v1579_v13, %v3031_v53  ;;  %v1861_v34 = vsel %vm722_vm8, %v1859_v30, %v3032_v25 }
 0x16f   : > { %v1473_v12 = vmul.f32 %v2911_v51, %v3776_v37  ;;  %v1344_v44 = vpop.f32.mrb[1].mxu1  ;;  %2967 = vmatprep.mubr.msk.bf16.mxu0 %vm763_vm9, %v3669_v60 }
 0x170   : > { %v1471_v21 = vmul.f32 %v3776_v37, %v1344_v44  ;;  %v2912_v8 = vpop.f32.mrb[2].mxu1 }
 0x171   : > { %v1505_v15 = vadd.f32 %v3786_v56, %v1473_v12  ;;  %v1474_v9 = vmul.f32 %v2912_v8, %v3776_v37  ;;  %v1347_v47 = vpop.f32.mrb[3].mxu1 }
 0x172   : > { %v1472_v61 = vmul.f32 %v3776_v37, %v1347_v47  ;;  %v1503_v35 = vadd.f32 %v3786_v56, %v1471_v21 }
 0x173   : > { %v1537_v0 = vmax.f32 %v1505_v15, 0.0  ;;  %v1506_v33 = vadd.f32 %v3786_v56, %v1474_v9  ;;  %2998 = vmatmul.mubr.msk.bf16.gmra.mrb[52].mxu1 %vm763_vm9, %v3680_v38 }
 0x174   : > { %3001 = vmatprep.mubr.msk.bf16.mxu1 %vm763_vm9, %v3683_v7  ;;  %v1504_v1 = vadd.f32 %v3786_v56, %v1472_v61  ;;  %v1535_v31 = vmax.f32 %v1503_v35, 0.0 }
 0x175   : > { %v1538_v58 = vmax.f32 %v1506_v33, 0.0  ;;  %2166 = vrot.lane.b32.xlu1 %v1537_v0, %s3066_s25 }
 0x176   : > { %2968 = vmatmul.mubr.msk.bf16.gmra.mrb[56].mxu0 %vm763_vm9, %v3693_v18  ;;  %v1536_v60 = vmax.f32 %v1504_v1, 0.0 }
 0x177   : > { %2168 = vrot.lane.b32.xlu0 %v1538_v58, %s3066_s25  ;;  %2971 = vmatprep.mubr.msk.bf16.mxu0 %vm763_vm9, %v3701_v23 }
 0x179   : > { %2162 = vrot.lane.b32.xlu1 %v1535_v31, %s3066_s25 }
 0x17b   : > { %2164 = vrot.lane.b32.xlu0 %v1536_v60, %s3066_s25  ;;  %3002 = vmatmul.mubr.msk.bf16.gmra.mrb[56].mxu1 %vm763_vm9, %v3714_v16 }
 0x17c   : > { %3005 = vmatprep.mubr.msk.bf16.mxu1 %vm763_vm9, %v3717_v29 }
 0x17e   : > { %2972 = vmatmul.mubr.msk.bf16.gmra.mrb[60].mxu0 %vm763_vm9, %v1581_v24 }
 0x181   : > { %v3820_v6 = vpop.f32.mrb[4].mxu0 }
 0x182   : > { %v3822_v45 = vpop.f32.mrb[5].mxu0 }
 0x183   : > { %v3824_v38 = vpop.f32.mrb[6].mxu0  ;;  %3006 = vmatmul.mubr.msk.bf16.gmra.mrb[60].mxu1 %vm763_vm9, %v1861_v34 }
 0x184   : > { %v3827_v43 = vpop.f32.mrb[7].mxu0 }
 0x186   : > { %v2915_v7 = vpop.f32.mrb[4].mxu1 }
 0x187   : > { %v1477_v28 = vmul.f32 %v2915_v7, %v3776_v37  ;;  %v1360_v46 = vpop.f32.mrb[5].mxu1 }
 0x188   : > { %v1475_v32 = vmul.f32 %v3776_v37, %v1360_v46  ;;  %v2916_v57 = vpop.f32.mrb[6].mxu1 }
 0x189   : > { %v1509_v36 = vadd.f32 %v3786_v56, %v1477_v28  ;;  %v1478_v2 = vmul.f32 %v2916_v57, %v3776_v37  ;;  %v1363_v18 = vpop.f32.mrb[7].mxu1 }
 0x18a   : > { %v1476_v50 = vmul.f32 %v3776_v37, %v1363_v18  ;;  %v1507_v54 = vadd.f32 %v3786_v56, %v1475_v32 }
 0x18b   : > { %v1541_v49 = vmax.f32 %v1509_v36, 0.0  ;;  %v1510_v62 = vadd.f32 %v3786_v56, %v1478_v2 }
 0x18c   : > { %v1508_v41 = vadd.f32 %v3786_v56, %v1476_v50  ;;  %v1539_v14 = vmax.f32 %v1507_v54, 0.0 }
 0x18d   : > { %v1542_v55 = vmax.f32 %v1510_v62, 0.0  ;;  %2174 = vrot.lane.b32.xlu1 %v1541_v49, %s3066_s25 }
 0x18e   : > { %v1540_v23 = vmax.f32 %v1508_v41, 0.0 }
 0x18f   : > { %2176 = vrot.lane.b32.xlu0 %v1542_v55, %s3066_s25 }
 0x191   : > { %2170 = vrot.lane.b32.xlu1 %v1539_v14, %s3066_s25 }
 0x193   : > { %2172 = vrot.lane.b32.xlu0 %v1540_v23, %s3066_s25 }
 0x199   : > { %v3841_v19 = vpop.f32.mrb[8].mxu0 }
 0x19a   : > { %v3843_v59 = vpop.f32.mrb[9].mxu0 }
 0x19b   : > { %v3845_v11 = vpop.f32.mrb[10].mxu0 }
 0x19c   : > { %v3847_v20 = vpop.f32.mrb[11].mxu0 }
 0x19e   : > { %v2919_v63 = vpop.f32.mrb[8].mxu1 }
 0x19f   : > { %v1481_v4 = vmul.f32 %v2919_v63, %v3776_v37  ;;  %v1376_v16 = vpop.f32.mrb[9].mxu1 }
 0x1a0   : > { %v1479_v29 = vmul.f32 %v3776_v37, %v1376_v16  ;;  %v2920_v51 = vpop.f32.mrb[10].mxu1 }
 0x1a1   : > { %v1513_v3 = vadd.f32 %v3786_v56, %v1481_v4  ;;  %v1482_v12 = vmul.f32 %v2920_v51, %v3776_v37  ;;  %v1379_v44 = vpop.f32.mrb[11].mxu1 }
 0x1a2   : > { %v1480_v21 = vmul.f32 %v3776_v37, %v1379_v44  ;;  %v1511_v15 = vadd.f32 %v3786_v56, %v1479_v29  ;;  %v966_v44 = vmul.f32 %v3765_v48, %v3776_v37 }
 0x1a3   : > { %v1545_v8 = vmax.f32 %v1513_v3, 0.0  ;;  %v1514_v9 = vadd.f32 %v3786_v56, %v1482_v12  ;;  %v965_v12 = vmul.f32 %v3757_v27, %v3776_v37 }
 0x1a4   : > { %v1512_v52 = vadd.f32 %v3786_v56, %v1480_v21  ;;  %v1543_v61 = vmax.f32 %v1511_v15, 0.0  ;;  %v963_v15 = vmul.f32 %v3776_v37, %v3761_v40 }
 0x1a5   : > { %v1546_v47 = vmax.f32 %v1514_v9, 0.0  ;;  %2182 = vrot.lane.b32.xlu1 %v1545_v8, %s3066_s25  ;;  %v1003_v8 = vadd.f32 %v3786_v56, %v965_v12 }
 0x1a6   : > { %v1544_v0 = vmax.f32 %v1512_v52, 0.0  ;;  %v1004_v52 = vadd.f32 %v3786_v56, %v966_v44  ;;  %v1001_v48 = vadd.f32 %v3786_v56, %v963_v15 }
 0x1a7   : > { %2184 = vrot.lane.b32.xlu0 %v1546_v47, %s3066_s25 }
 0x1a8   : > { %v1036_v40 = vmax.f32 %v1004_v52, 0.0 }
 0x1a9   : > { %2178 = vrot.lane.b32.xlu1 %v1543_v61, %s3066_s25  ;;  %v964_v61 = vmul.f32 %v3776_v37, %v3767_v5 }
 0x1ab   : > { %2180 = vrot.lane.b32.xlu0 %v1544_v0, %s3066_s25  ;;  %v1035_v0 = vmax.f32 %v1003_v8, 0.0  ;;  %v968_v8 = vmul.f32 %v3776_v37, %v3827_v43 }
 0x1b1   : > { %v3861_v35 = vpop.f32.mrb[12].mxu0 }
 0x1b2   : > { %v3863_v33 = vpop.f32.mrb[13].mxu0 }
 0x1b3   : > { %v3865_v42 = vpop.f32.mrb[14].mxu0 }
 0x1b4   : > { %v3867_v39 = vpop.f32.mrb[15].mxu0 }
 0x1b6   : > { %v2923_v58 = vpop.f32.mrb[12].mxu1 }
 0x1b7   : > { %v1485_v1 = vmul.f32 %v2923_v58, %v3776_v37  ;;  %v1392_v10 = vpop.f32.mrb[13].mxu1 }
 0x1b8   : > { %v1483_v31 = vmul.f32 %v3776_v37, %v1392_v10  ;;  %v2924_v53 = vpop.f32.mrb[14].mxu1 }
 0x1b9   : > { %v1517_v17 = vadd.f32 %v3786_v56, %v1485_v1  ;;  %v1486_v13 = vmul.f32 %v2924_v53, %v3776_v37  ;;  %v1395_v60 = vpop.f32.mrb[15].mxu1  ;;  %v1002_v53 = vadd.f32 %v3786_v56, %v964_v61 }
 0x1ba   : > { %v1484_v22 = vmul.f32 %v3776_v37, %v1395_v60  ;;  %v1515_v24 = vadd.f32 %v3786_v56, %v1483_v31 }
 0x1bb   : > { %v1549_v26 = vmax.f32 %v1517_v17, 0.0  ;;  %v1518_v25 = vadd.f32 %v3786_v56, %v1486_v13 }
 0x1bc   : > { %v1516_v34 = vadd.f32 %v3786_v56, %v1484_v22  ;;  %v1547_v7 = vmax.f32 %v1515_v24, 0.0 }
 0x1bd   : > { %v1550_v30 = vmax.f32 %v1518_v25, 0.0  ;;  %2190 = vrot.lane.b32.xlu1 %v1549_v26, %s3066_s25  ;;  %v1033_v25 = vmax.f32 %v1001_v48, 0.0 }
 0x1be   : > { %v1548_v28 = vmax.f32 %v1516_v34, 0.0 }
 0x1bf   : > { %2192 = vrot.lane.b32.xlu0 %v1550_v30, %s3066_s25 }
 0x1c1   : > { %2186 = vrot.lane.b32.xlu1 %v1547_v7, %s3066_s25 }
 0x1c3   : > { %2188 = vrot.lane.b32.xlu0 %v1548_v28, %s3066_s25 }
 0x1c9   : > { %v3881_v46 = vpop.f32.mrb[16].mxu0 }
 0x1ca   : > { %v3883_v32 = vpop.f32.mrb[17].mxu0 }
 0x1cb   : > { %v3885_v57 = vpop.f32.mrb[18].mxu0 }
 0x1cc   : > { %v3887_v36 = vpop.f32.mrb[19].mxu0 }
 0x1ce   : > { %v2927_v2 = vpop.f32.mrb[16].mxu1 }
 0x1cf   : > { %v1489_v18 = vmul.f32 %v2927_v2, %v3776_v37  ;;  %v1408_v50 = vpop.f32.mrb[17].mxu1 }
 0x1d0   : > { %v1487_v49 = vmul.f32 %v3776_v37, %v1408_v50  ;;  %v2928_v54 = vpop.f32.mrb[18].mxu1  ;;  %v1034_v50 = vmax.f32 %v1002_v53, 0.0 }
 0x1d1   : > { %v1521_v62 = vadd.f32 %v3786_v56, %v1489_v18  ;;  %v1490_v55 = vmul.f32 %v2928_v54, %v3776_v37  ;;  %v1411_v41 = vpop.f32.mrb[19].mxu1 }
 0x1d2   : > { %v1488_v14 = vmul.f32 %v3776_v37, %v1411_v41  ;;  %v1519_v63 = vadd.f32 %v3786_v56, %v1487_v49 }
 0x1d3   : > { %v1553_v23 = vmax.f32 %v1521_v62, 0.0  ;;  %v1522_v4 = vadd.f32 %v3786_v56, %v1490_v55 }
 0x1d4   : > { %v1520_v29 = vadd.f32 %v3786_v56, %v1488_v14  ;;  %v1551_v51 = vmax.f32 %v1519_v63, 0.0  ;;  %v969_v63 = vmul.f32 %v3820_v6, %v3776_v37 }
 0x1d5   : > { %v1554_v16 = vmax.f32 %v1522_v4, 0.0  ;;  %2198 = vrot.lane.b32.xlu1 %v1553_v23, %s3066_s25  ;;  %v970_v4 = vmul.f32 %v3824_v38, %v3776_v37 }
 0x1d6   : > { %v1552_v3 = vmax.f32 %v1520_v29, 0.0  ;;  %v1007_v29 = vadd.f32 %v3786_v56, %v969_v63 }
 0x1d7   : > { %2200 = vrot.lane.b32.xlu0 %v1554_v16, %s3066_s25  ;;  %v1008_v44 = vadd.f32 %v3786_v56, %v970_v4 }
 0x1d8   : > { %v1039_v15 = vmax.f32 %v1007_v29, 0.0  ;;  %v971_v29 = vmul.f32 %v3776_v37, %v3843_v59 }
 0x1d9   : > { %2194 = vrot.lane.b32.xlu1 %v1551_v51, %s3066_s25  ;;  %v967_v51 = vmul.f32 %v3776_v37, %v3822_v45  ;;  %v1040_v45 = vmax.f32 %v1008_v44, 0.0 }
 0x1db   : > { %2196 = vrot.lane.b32.xlu0 %v1552_v3, %s3066_s25  ;;  %v1005_v38 = vadd.f32 %v3786_v56, %v967_v51 }
 0x1e1   : > { %v3905_v21 = vpop.f32.mrb[20].mxu0 }
 0x1e2   : > { %v3910_v9 = vpop.f32.mrb[21].mxu0 }
 0x1e3   : > { %v3912_v47 = vpop.f32.mrb[22].mxu0 }
 0x1e4   : > { %v3917_v27 = vpop.f32.mrb[23].mxu0 }
 0x1e6   : > { %v2931_v58 = vpop.f32.mrb[20].mxu1 }
 0x1e7   : > { %v1493_v1 = vmul.f32 %v2931_v58, %v3776_v37  ;;  %v1424_v10 = vpop.f32.mrb[21].mxu1  ;;  %v2167_v31 = vpop.permute.xlu1 %2166  ;;  %v1006_v58 = vadd.f32 %v3786_v56, %v968_v8 }
 0x1e8   : > { %v1491_v17 = vmul.f32 %v3776_v37, %v1424_v10  ;;  %v3924_v13 = vsel %vm689_vm7, %v1035_v0, %v2167_v31  ;;  %v2932_v60 = vpop.f32.mrb[22].mxu1 }
 0x1e9   : > { %v1525_v5 = vadd.f32 %v3786_v56, %v1493_v1  ;;  %v1494_v22 = vmul.f32 %v2932_v60, %v3776_v37  ;;  %v2169_v26 = vpop.permute.xlu0 %2168  ;;  %v1427_v24 = vpop.f32.mrb[23].mxu1  ;;  %v1037_v60 = vmax.f32 %v1005_v38, 0.0 }
 0x1ea   : > { %v3929_v30 = vsel %vm689_vm7, %v1036_v40, %v2169_v26  ;;  %v1492_v34 = vmul.f32 %v3776_v37, %v1427_v24  ;;  %v1523_v28 = vadd.f32 %v3786_v56, %v1491_v17 }
 0x1eb   : > { %v1557_v7 = vmax.f32 %v1525_v5, 0.0  ;;  %v1526_v2 = vadd.f32 %v3786_v56, %v1494_v22  ;;  %v2163_v18 = vpop.permute.xlu1 %2162 }
 0x1ec   : > { %v3935_v49 = vsel %vm689_vm7, %v1033_v25, %v2163_v18  ;;  %v1524_v62 = vadd.f32 %v3786_v56, %v1492_v34  ;;  %v1555_v14 = vmax.f32 %v1523_v28, 0.0 }
 0x1ed   : > { %v1558_v54 = vmax.f32 %v1526_v2, 0.0  ;;  %v2165_v55 = vpop.permute.xlu0 %2164  ;;  %2206 = vrot.lane.b32.xlu1 %v1557_v7, %s3066_s25  ;;  %v1038_v7 = vmax.f32 %v1006_v58, 0.0 }
 0x1ee   : > { %v3940_v41 = vsel %vm689_vm7, %v1034_v50, %v2165_v55  ;;  %v1556_v23 = vmax.f32 %v1524_v62, 0.0 }
 0x1ef   : > { %2208 = vrot.lane.b32.xlu0 %v1558_v54, %s3066_s25 }
 0x1f1   : > { %2202 = vrot.lane.b32.xlu1 %v1555_v14, %s3066_s25  ;;  %v973_v14 = vmul.f32 %v3841_v19, %v3776_v37 }
 0x1f3   : > { %2204 = vrot.lane.b32.xlu0 %v1556_v23, %s3066_s25  ;;  %v974_v23 = vmul.f32 %v3845_v11, %v3776_v37  ;;  %v1011_v4 = vadd.f32 %v3786_v56, %v973_v14  ;;  %v1009_v11 = vadd.f32 %v3786_v56, %v971_v29 }
 0x1f5   : > { %v1012_v8 = vadd.f32 %v3786_v56, %v974_v23  ;;  %v1043_v38 = vmax.f32 %v1011_v4, 0.0 }
 0x1f7   : > { %v1044_v59 = vmax.f32 %v1012_v8, 0.0 }
 0x1f9   : > { %v3949_v16 = vpop.f32.mrb[24].mxu0 }
 0x1fa   : > { %v3954_v3 = vpop.f32.mrb[25].mxu0 }
 0x1fb   : > { %v3956_v12 = vpop.f32.mrb[26].mxu0 }
 0x1fc   : > { %v3961_v6 = vpop.f32.mrb[27].mxu0 }
 0x1fe   : > { %v2935_v52 = vpop.f32.mrb[24].mxu1 }
 0x1ff   : > { %v1497_v61 = vmul.f32 %v2935_v52, %v3776_v37  ;;  %v1440_v0 = vpop.f32.mrb[25].mxu1  ;;  %v2175_v48 = vpop.permute.xlu1 %2174 }
 0x200   : > { %v1495_v1 = vmul.f32 %v3776_v37, %v1440_v0  ;;  %v3968_v10 = vsel %vm689_vm7, %v1039_v15, %v2175_v48  ;;  %v2936_v31 = vpop.f32.mrb[26].mxu1  ;;  %v972_v15 = vmul.f32 %v3776_v37, %v3847_v20 }
 0x201   : > { %4686 = vst [vmem:[#allocation2_spill] sm:$0xff] %v3968_v10  ;;  %v1529_v43 = vadd.f32 %v3786_v56, %v1497_v61  ;;  %v1498_v40 = vmul.f32 %v2936_v31, %v3776_v37  ;;  %v2177_v53 = vpop.permute.xlu0 %2176  ;;  %v1443_v17 = vpop.f32.mrb[27].mxu1 }
 0x202   : > { %v3973_v5 = vsel %vm689_vm7, %v1040_v45, %v2177_v53  ;;  %v1496_v22 = vmul.f32 %v3776_v37, %v1443_v17  ;;  %v1527_v24 = vadd.f32 %v3786_v56, %v1495_v1  ;;  %v1010_v45 = vadd.f32 %v3786_v56, %v972_v15 }
 0x203   : > { %4687 = vst [vmem:[#allocation3_spill] sm:$0xff] %v3973_v5  ;;  %v1561_v26 = vmax.f32 %v1529_v43, 0.0  ;;  %v1530_v25 = vadd.f32 %v3786_v56, %v1498_v40  ;;  %v2171_v34 = vpop.permute.xlu1 %2170  ;;  %v1041_v17 = vmax.f32 %v1009_v11, 0.0 }
 0x204   : > { %v3979_v28 = vsel %vm689_vm7, %v1037_v60, %v2171_v34  ;;  %v1528_v18 = vadd.f32 %v3786_v56, %v1496_v22  ;;  %v1559_v62 = vmax.f32 %v1527_v24, 0.0 }
 0x205   : > { %4688 = vst [vmem:[#allocation4_spill] sm:$0xff] %v3979_v28  ;;  %v1562_v2 = vmax.f32 %v1530_v25, 0.0  ;;  %v2173_v50 = vpop.permute.xlu0 %2172  ;;  %2214 = vrot.lane.b32.xlu1 %v1561_v26, %s3066_s25 }
 0x206   : > { %v3984_v54 = vsel %vm689_vm7, %v1038_v7, %v2173_v50  ;;  %v1560_v55 = vmax.f32 %v1528_v18, 0.0  ;;  %v1042_v50 = vmax.f32 %v1010_v45, 0.0 }
 0x207   : > { %4689 = vst [vmem:[#allocation5_spill] sm:$0xff] %v3984_v54  ;;  %2216 = vrot.lane.b32.xlu0 %v1562_v2, %s3066_s25 }
 0x209   : > { %2210 = vrot.lane.b32.xlu1 %v1559_v62, %s3066_s25 }
 0x20b   : > { %2212 = vrot.lane.b32.xlu0 %v1560_v55, %s3066_s25 }
 0x211   : > { %v3993_v63 = vpop.f32.mrb[28].mxu0 }
 0x212   : > { %v3998_v51 = vpop.f32.mrb[29].mxu0 }
 0x213   : > { %v4000_v44 = vpop.f32.mrb[30].mxu0 }
 0x214   : > { %v4005_v19 = vpop.f32.mrb[31].mxu0 }
 0x216   : > { %v2939_v52 = vpop.f32.mrb[28].mxu1 }
 0x217   : > { %v1501_v61 = vmul.f32 %v2939_v52, %v3776_v37  ;;  %v1456_v0 = vpop.f32.mrb[29].mxu1  ;;  %v2183_v48 = vpop.permute.xlu1 %2182 }
 0x218   : > { %v1499_v58 = vmul.f32 %v3776_v37, %v1456_v0  ;;  %v4012_v1 = vsel %vm689_vm7, %v1043_v38, %v2183_v48  ;;  %v2940_v31 = vpop.f32.mrb[30].mxu1 }
 0x219   : > { %4690 = vst [vmem:[#allocation6_spill] sm:$0xff] %v4012_v1  ;;  %v1533_v20 = vadd.f32 %v3786_v56, %v1501_v61  ;;  %v1502_v43 = vmul.f32 %v2940_v31, %v3776_v37  ;;  %v2185_v40 = vpop.permute.xlu0 %2184  ;;  %v1459_v53 = vpop.f32.mrb[31].mxu1 }
 0x21a   : > { %v4017_v60 = vsel %vm689_vm7, %v1044_v59, %v2185_v40  ;;  %v1500_v22 = vmul.f32 %v3776_v37, %v1459_v53  ;;  %v2945_v26 = vpop.f32.mrb[32].mxu0  ;;  %v1531_v25 = vadd.f32 %v3786_v56, %v1499_v58 }
 0x21b   : > { %4691 = vst [vmem:[#allocation7_spill] sm:$0xff] %v4017_v60  ;;  %v1565_v24 = vmax.f32 %v1533_v20, 0.0  ;;  %v1534_v34 = vadd.f32 %v3786_v56, %v1502_v43  ;;  %v1756_v7 = vmul.f32 %v2945_v26, %v3776_v37  ;;  %v1627_v2 = vpop.f32.mrb[33].mxu0  ;;  %v2179_v18 = vpop.permute.xlu1 %2178 }
 0x21c   : > { %v4024_v62 = vsel %vm689_vm7, %v1041_v17, %v2179_v18  ;;  %v2946_v55 = vpop.f32.mrb[34].mxu0  ;;  %v1532_v23 = vadd.f32 %v3786_v56, %v1500_v22  ;;  %v1563_v11 = vmax.f32 %v1531_v25, 0.0  ;;  %v1754_v53 = vmul.f32 %v3776_v37, %v1627_v2 }
 0x21d   : > { %4692 = vst [vmem:[#allocation8_spill] sm:$0xff] %v4024_v62  ;;  %v1566_v14 = vmax.f32 %v1534_v34, 0.0  ;;  %v1757_v4 = vmul.f32 %v2946_v55, %v3776_v37  ;;  %v1630_v29 = vpop.f32.mrb[35].mxu0  ;;  %v2181_v8 = vpop.permute.xlu0 %2180  ;;  %2222 = vrot.lane.b32.xlu1 %v1565_v24, %s3066_s25  ;;  %v1788_v52 = vadd.f32 %v3786_v56, %v1756_v7  ;;  %v977_v7 = vmul.f32 %v3861_v35, %v3776_v37 }
 0x21e   : > { %v4030_v15 = vsel %vm689_vm7, %v1042_v50, %v2181_v8  ;;  %v2979_v38 = vpop.f32.mrb[32].mxu1  ;;  %v1564_v59 = vmax.f32 %v1532_v23, 0.0  ;;  %v1755_v25 = vmul.f32 %v3776_v37, %v1630_v29  ;;  %v1786_v2 = vadd.f32 %v3786_v56, %v1754_v53 }
 0x21f   : > { %4693 = vst [vmem:[#allocation9_spill] sm:$0xff] %v4030_v15  ;;  %v2036_v61 = vmul.f32 %v2979_v38, %v3776_v37  ;;  %2224 = vrot.lane.b32.xlu0 %v1566_v14, %s3066_s25  ;;  %v1907_v0 = vpop.f32.mrb[33].mxu1  ;;  %v1789_v45 = vadd.f32 %v3786_v56, %v1757_v4  ;;  %v1820_v40 = vmax.f32 %v1788_v52, 0.0  ;;  %v978_v23 = vmul.f32 %v3865_v42, %v3776_v37 }
 0x220   : > { %v2980_v48 = vpop.f32.mrb[34].mxu1  ;;  %v2034_v55 = vmul.f32 %v3776_v37, %v1907_v0  ;;  %v1787_v29 = vadd.f32 %v3786_v56, %v1755_v25  ;;  %v1015_v52 = vadd.f32 %v3786_v56, %v977_v7  ;;  %v1818_v42 = vmax.f32 %v1786_v2, 0.0 }
 0x221   : > { %v2037_v58 = vmul.f32 %v2980_v48, %v3776_v37  ;;  %2218 = vrot.lane.b32.xlu1 %v1563_v11, %s3066_s25  ;;  %v2949_v31 = vpop.f32.mrb[36].mxu0  ;;  %v1910_v20 = vpop.f32.mrb[35].mxu1  ;;  %v2068_v17 = vadd.f32 %v3786_v56, %v2036_v61  ;;  %v1821_v24 = vmax.f32 %v1789_v45, 0.0  ;;  %v975_v61 = vmul.f32 %v3776_v37, %v3863_v33 }
 0x222   : > { %v4038_v43 = vpop.f32.mrb[37].mxu0  ;;  %v2035_v38 = vmul.f32 %v3776_v37, %v1910_v20  ;;  %v2066_v48 = vadd.f32 %v3786_v56, %v2034_v55  ;;  %v976_v20 = vmul.f32 %v3776_v37, %v3867_v39  ;;  %v1819_v53 = vmax.f32 %v1787_v29, 0.0 }
 0x223   : > { %2220 = vrot.lane.b32.xlu0 %v1564_v59, %s3066_s25  ;;  %v2950_v22 = vpop.f32.mrb[38].mxu0  ;;  %v2069_v34 = vadd.f32 %v3786_v56, %v2037_v58  ;;  %v2100_v50 = vmax.f32 %v2068_v17, 0.0  ;;  %v1760_v59 = vmul.f32 %v2949_v31, %v3776_v37  ;;  %v1016_v58 = vadd.f32 %v3786_v56, %v978_v23 }
 0x224   : > { %v4043_v26 = vpop.f32.mrb[39].mxu0  ;;  %v2067_v33 = vadd.f32 %v3786_v56, %v2035_v38  ;;  %v1761_v17 = vmul.f32 %v2950_v22, %v3776_v37  ;;  %v1013_v31 = vadd.f32 %v3786_v56, %v975_v61  ;;  %v1014_v22 = vadd.f32 %v3786_v56, %v976_v20 }
 0x225   : > { %2294 = vrot.lane.b32.xlu1 %v1820_v40, %s3067_s10  ;;  %v2101_v8 = vmax.f32 %v2069_v34, 0.0  ;;  %v2098_v34 = vmax.f32 %v2066_v48, 0.0  ;;  %v1792_v7 = vadd.f32 %v3786_v56, %v1760_v59  ;;  %v1048_v55 = vmax.f32 %v1016_v58, 0.0 }
 0x226   : > { %v2983_v18 = vpop.f32.mrb[36].mxu1  ;;  %v1793_v38 = vadd.f32 %v3786_v56, %v1761_v17  ;;  %v1758_v20 = vmul.f32 %v3776_v37, %v4038_v43  ;;  %v1046_v17 = vmax.f32 %v1014_v22, 0.0 }
 0x227   : > { %v4052_v14 = vpop.f32.mrb[37].mxu1  ;;  %2296 = vrot.lane.b32.xlu0 %v1821_v24, %s3067_s10  ;;  %v1047_v24 = vmax.f32 %v1015_v52, 0.0  ;;  %v2040_v2 = vmul.f32 %v2983_v18, %v3776_v37  ;;  %v1045_v18 = vmax.f32 %v1013_v31, 0.0  ;;  %v1824_v58 = vmax.f32 %v1792_v7, 0.0 }
 0x228   : > { %v2984_v4 = vpop.f32.mrb[38].mxu1  ;;  %v1759_v7 = vmul.f32 %v3776_v37, %v4043_v26 }
 0x229   : > { %v4059_v35 = vpop.f32.mrb[39].mxu1  ;;  %2422 = vrot.lane.b32.xlu1 %v2100_v50, %s3068_s11  ;;  %v4062_v11 = vpop.f32.mrb[40].mxu0  ;;  %v2041_v52 = vmul.f32 %v2984_v4, %v3776_v37 }
 0x22a   : > { %v4067_v0 = vpop.f32.mrb[41].mxu0 }
 0x22b   : > { %2424 = vrot.lane.b32.xlu0 %v2101_v8, %s3068_s11  ;;  %v4072_v45 = vpop.f32.mrb[42].mxu0  ;;  %v2099_v8 = vmax.f32 %v2067_v33, 0.0 }
 0x22c   : > { %v4077_v40 = vpop.f32.mrb[43].mxu0 }
 0x22d   : > { %2290 = vrot.lane.b32.xlu1 %v1818_v42, %s3067_s10 }
 0x22e   : > { %v4083_v25 = vpop.f32.mrb[40].mxu1 }
 0x22f   : > { %v4087_v39 = vpop.f32.mrb[41].mxu1  ;;  %v2191_v50 = vpop.permute.xlu1 %2190  ;;  %2292 = vrot.lane.b32.xlu0 %v1819_v53, %s3067_s10  ;;  %v2072_v53 = vadd.f32 %v3786_v56, %v2040_v2 }
 0x230   : > { %v4092_v23 = vsel %vm689_vm7, %v1047_v24, %v2191_v50  ;;  %v2988_v29 = vpop.f32.mrb[42].mxu1  ;;  %v2073_v50 = vadd.f32 %v3786_v56, %v2041_v52  ;;  %v1791_v52 = vadd.f32 %v3786_v56, %v1759_v7 }
 0x231   : > { %4694 = vst [vmem:[#allocation10_spill] sm:$0xff] %v4092_v23  ;;  %v2193_v61 = vpop.permute.xlu0 %2192  ;;  %v4096_v42 = vpop.f32.mrb[43].mxu1  ;;  %2418 = vrot.lane.b32.xlu1 %v2098_v34, %s3068_s11  ;;  %v1825_v34 = vmax.f32 %v1793_v38, 0.0  ;;  %v2038_v38 = vmul.f32 %v3776_v37, %v4052_v14 }
 0x232   : > { %v4100_v48 = vsel %vm689_vm7, %v1048_v55, %v2193_v61  ;;  %v4102_v59 = vpop.f32.mrb[44].mxu0  ;;  %v2104_v61 = vmax.f32 %v2072_v53, 0.0 }
 0x233   : > { %4695 = vst [vmem:[#allocation11_spill] sm:$0xff] %v4100_v48  ;;  %v4107_v33 = vpop.f32.mrb[45].mxu0  ;;  %v2187_v4 = vpop.permute.xlu1 %2186  ;;  %2420 = vrot.lane.b32.xlu0 %v2099_v8, %s3068_s11  ;;  %v1790_v8 = vadd.f32 %v3786_v56, %v1758_v20 }
 0x234   : > { %v4111_v24 = vsel %vm689_vm7, %v1045_v18, %v2187_v4  ;;  %v4113_v31 = vpop.f32.mrb[46].mxu0  ;;  %v2039_v4 = vmul.f32 %v3776_v37, %v4059_v35  ;;  %v1823_v35 = vmax.f32 %v1791_v52, 0.0 }
 0x235   : > { %4696 = vst [vmem:[#allocation12_spill] sm:$0xff] %v4111_v24  ;;  %v4118_v43 = vpop.f32.mrb[47].mxu0  ;;  %v2189_v2 = vpop.permute.xlu0 %2188  ;;  %2302 = vrot.lane.b32.xlu1 %v1824_v58, %s3067_s10  ;;  %v2105_v58 = vmax.f32 %v2073_v50, 0.0  ;;  %v1822_v14 = vmax.f32 %v1790_v8, 0.0  ;;  %v981_v8 = vmul.f32 %v3881_v46, %v3776_v37  ;;  %v2044_v24 = vmul.f32 %v4083_v25, %v3776_v37 }
 0x236   : > { %v4122_v55 = vsel %vm689_vm7, %v1046_v17, %v2189_v2  ;;  %v4124_v22 = vpop.f32.mrb[44].mxu1  ;;  %v2070_v2 = vadd.f32 %v3786_v56, %v2038_v38 }
 0x237   : > { %4697 = vst [vmem:[#allocation13_spill] sm:$0xff] %v4122_v55  ;;  %v4129_v18 = vpop.f32.mrb[45].mxu1  ;;  %2304 = vrot.lane.b32.xlu0 %v1825_v34, %s3067_s10  ;;  %v1764_v34 = vmul.f32 %v4062_v11, %v3776_v37  ;;  %v2071_v55 = vadd.f32 %v3786_v56, %v2039_v4  ;;  %v1019_v25 = vadd.f32 %v3786_v56, %v981_v8 }
 0x238   : > { %v4132_v26 = vpop.f32.mrb[46].mxu1  ;;  %v2102_v11 = vmax.f32 %v2070_v2, 0.0  ;;  %v980_v8 = vmul.f32 %v3776_v37, %v3887_v36  ;;  %v2042_v36 = vmul.f32 %v3776_v37, %v4087_v39  ;;  %v2046_v28 = vmul.f32 %v3776_v37, %v4129_v18 }
 0x239   : > { %v4137_v17 = vpop.f32.mrb[47].mxu1  ;;  %2430 = vrot.lane.b32.xlu1 %v2104_v61, %s3068_s11  ;;  %v4140_v20 = vpop.f32.mrb[48].mxu0  ;;  %v1765_v61 = vmul.f32 %v4072_v45, %v3776_v37  ;;  %v982_v45 = vmul.f32 %v3885_v57, %v3776_v37  ;;  %v2103_v4 = vmax.f32 %v2071_v55, 0.0  ;;  %v1762_v55 = vmul.f32 %v3776_v37, %v4067_v0 }
 0x23a   : > { %v4142_v53 = vpop.f32.mrb[49].mxu0  ;;  %v1051_v0 = vmax.f32 %v1019_v25, 0.0  ;;  %v2047_v5 = vmul.f32 %v3776_v37, %v4137_v17  ;;  %v1772_v10 = vmul.f32 %v4140_v20, %v3776_v37  ;;  %v984_v17 = vmul.f32 %v3776_v37, %v3917_v27 }
 0x23b   : > { %2432 = vrot.lane.b32.xlu0 %v2105_v58, %s3068_s11  ;;  %v4148_v7 = vpop.f32.mrb[50].mxu0  ;;  %v1796_v58 = vadd.f32 %v3786_v56, %v1764_v34  ;;  %v1797_v46 = vadd.f32 %v3786_v56, %v1765_v61  ;;  %v2076_v61 = vadd.f32 %v3786_v56, %v2044_v24 }
 0x23c   : > { %v4150_v50 = vpop.f32.mrb[51].mxu0  ;;  %v1804_v20 = vadd.f32 %v3786_v56, %v1772_v10 }
 0x23d   : > { %2298 = vrot.lane.b32.xlu1 %v1822_v14, %s3067_s10  ;;  %v2045_v14 = vmul.f32 %v2988_v29, %v3776_v37  ;;  %v1828_v57 = vmax.f32 %v1796_v58, 0.0  ;;  %v1763_v58 = vmul.f32 %v3776_v37, %v4077_v40  ;;  %v2108_v60 = vmax.f32 %v2076_v61, 0.0 }
 0x23e   : > { %v4158_v38 = vpop.f32.mrb[48].mxu1  ;;  %v2043_v61 = vmul.f32 %v3776_v37, %v4096_v42 }
 0x23f   : > { %v4163_v48 = vpop.f32.mrb[49].mxu1  ;;  %2300 = vrot.lane.b32.xlu0 %v1823_v35, %s3067_s10  ;;  %v979_v35 = vmul.f32 %v3776_v37, %v3883_v32  ;;  %v1829_v32 = vmax.f32 %v1797_v46, 0.0  ;;  %v2077_v62 = vadd.f32 %v3786_v56, %v2045_v14  ;;  %v1018_v14 = vadd.f32 %v3786_v56, %v980_v8 }
 0x240   : > { %v4168_v52 = vpop.f32.mrb[50].mxu1 }
 0x241   : > { %v4172_v2 = vpop.f32.mrb[51].mxu1  ;;  %2426 = vrot.lane.b32.xlu1 %v2102_v11, %s3068_s11  ;;  %v4175_v34 = vpop.f32.mrb[52].mxu0  ;;  %v1020_v11 = vadd.f32 %v3786_v56, %v982_v45  ;;  %v1017_v24 = vadd.f32 %v3786_v56, %v979_v35  ;;  %v1794_v45 = vadd.f32 %v3786_v56, %v1762_v55  ;;  %v2109_v55 = vmax.f32 %v2077_v62, 0.0 }
 0x242   : > { %v4180_v23 = vpop.f32.mrb[53].mxu0  ;;  %v1768_v62 = vmul.f32 %v4102_v59, %v3776_v37 }
 0x243   : > { %2428 = vrot.lane.b32.xlu0 %v2103_v4, %s3068_s11  ;;  %v4186_v29 = vpop.f32.mrb[54].mxu0  ;;  %v1052_v40 = vmax.f32 %v1020_v11, 0.0 }
 0x244   : > { %v4191_v15 = vpop.f32.mrb[55].mxu0 }
 0x245   : > { %2310 = vrot.lane.b32.xlu1 %v1828_v57, %s3067_s10  ;;  %v1795_v57 = vadd.f32 %v3786_v56, %v1763_v58 }
 0x246   : > { %v4198_v4 = vpop.f32.mrb[52].mxu1 }
 0x247   : > { %v4203_v1 = vpop.f32.mrb[53].mxu1  ;;  %v2199_v46 = vpop.permute.xlu1 %2198  ;;  %2312 = vrot.lane.b32.xlu0 %v1829_v32, %s3067_s10  ;;  %v1049_v32 = vmax.f32 %v1017_v24, 0.0 }
 0x248   : > { %v4208_v25 = vsel %vm689_vm7, %v1051_v0, %v2199_v46  ;;  %v4210_v35 = vpop.f32.mrb[54].mxu1  ;;  %v1826_v0 = vmax.f32 %v1794_v45, 0.0  ;;  %v2074_v46 = vadd.f32 %v3786_v56, %v2042_v36  ;;  %v1769_v45 = vmul.f32 %v4113_v31, %v3776_v37 }
 0x249   : > { %4698 = vst [vmem:[#allocation14_spill] sm:$0xff] %v4208_v25  ;;  %v2201_v39 = vpop.permute.xlu0 %2200  ;;  %v4215_v54 = vpop.f32.mrb[55].mxu1  ;;  %2438 = vrot.lane.b32.xlu1 %v2108_v60, %s3068_s11  ;;  %v1050_v25 = vmax.f32 %v1018_v14, 0.0 }
 0x24a   : > { %v4219_v11 = vsel %vm689_vm7, %v1052_v40, %v2201_v39  ;;  %v4221_v8 = vpop.f32.mrb[56].mxu0  ;;  %v1827_v40 = vmax.f32 %v1795_v57, 0.0  ;;  %v2075_v39 = vadd.f32 %v3786_v56, %v2043_v61  ;;  %v2048_v57 = vmul.f32 %v4124_v22, %v3776_v37 }
 0x24b   : > { %4699 = vst [vmem:[#allocation15_spill] sm:$0xff] %v4219_v11  ;;  %v4226_v58 = vpop.f32.mrb[57].mxu0  ;;  %v2195_v42 = vpop.permute.xlu1 %2194  ;;  %2440 = vrot.lane.b32.xlu0 %v2109_v55, %s3068_s11  ;;  %v2106_v55 = vmax.f32 %v2074_v46, 0.0 }
 0x24c   : > { %v4230_v60 = vsel %vm689_vm7, %v1049_v32, %v2195_v42  ;;  %v4232_v24 = vpop.f32.mrb[58].mxu0  ;;  %v1800_v32 = vadd.f32 %v3786_v56, %v1768_v62  ;;  %v2107_v42 = vmax.f32 %v2075_v39, 0.0 }
 0x24d   : > { %4700 = vst [vmem:[#allocation16_spill] sm:$0xff] %v4230_v60  ;;  %v4237_v36 = vpop.f32.mrb[59].mxu0  ;;  %v2197_v59 = vpop.permute.xlu0 %2196  ;;  %2306 = vrot.lane.b32.xlu1 %v1826_v0, %s3067_s10  ;;  %v1801_v0 = vadd.f32 %v3786_v56, %v1769_v45 }
 0x24e   : > { %v4241_v11 = vsel %vm689_vm7, %v1050_v25, %v2197_v59  ;;  %v4243_v14 = vpop.f32.mrb[56].mxu1  ;;  %v2049_v25 = vmul.f32 %v4132_v26, %v3776_v37  ;;  %v1832_v22 = vmax.f32 %v1800_v32, 0.0  ;;  %v985_v32 = vmul.f32 %v3905_v21, %v3776_v37 }
 0x24f   : > { %4701 = vst [vmem:[#allocation17_spill] sm:$0xff] %v4241_v11  ;;  %v4248_v61 = vpop.f32.mrb[57].mxu1  ;;  %2308 = vrot.lane.b32.xlu0 %v1827_v40, %s3067_s10  ;;  %v1766_v40 = vmul.f32 %v3776_v37, %v4107_v33  ;;  %v2080_v11 = vadd.f32 %v3786_v56, %v2048_v57  ;;  %v1833_v26 = vmax.f32 %v1801_v0, 0.0 }
 0x250   : > { %v4251_v31 = vpop.f32.mrb[58].mxu1  ;;  %v2081_v60 = vadd.f32 %v3786_v56, %v2049_v25  ;;  %v1023_v18 = vadd.f32 %v3786_v56, %v985_v32  ;;  %v1773_v32 = vmul.f32 %v4148_v7, %v3776_v37  ;;  %v4322_v7 = vld [vmem:[%s4680_s3] ss:$0 sm:$0xff] }
 0x251   : > { %v4256_v59 = vpop.f32.mrb[59].mxu1  ;;  %2434 = vrot.lane.b32.xlu1 %v2106_v55, %s3068_s11  ;;  %v4259_v46 = vpop.f32.mrb[60].mxu0  ;;  %v1767_v55 = vmul.f32 %v3776_v37, %v4118_v43  ;;  %v1798_v57 = vadd.f32 %v3786_v56, %v1766_v40  ;;  %v986_v43 = vmul.f32 %v3912_v47, %v3776_v37  ;;  %v983_v40 = vmul.f32 %v3776_v37, %v3910_v9 }
 0x252   : > { %v4261_v62 = vpop.f32.mrb[61].mxu0  ;;  %v2113_v21 = vmax.f32 %v2081_v60, 0.0  ;;  %v2078_v47 = vadd.f32 %v3786_v56, %v2046_v28  ;;  %v1055_v9 = vmax.f32 %v1023_v18, 0.0 }
 0x253   : > { %2436 = vrot.lane.b32.xlu0 %v2107_v42, %s3068_s11  ;;  %v4267_v39 = vpop.f32.mrb[62].mxu0  ;;  %v2112_v42 = vmax.f32 %v2080_v11, 0.0  ;;  %v1024_v60 = vadd.f32 %v3786_v56, %v986_v43  ;;  %v1021_v28 = vadd.f32 %v3786_v56, %v983_v40  ;;  %v4314_v43 = vld [vmem:[%s4679_s2] ss:$0 sm:$0xff] }
 0x254   : > { %v4269_v45 = vpop.f32.mrb[63].mxu0  ;;  %v2052_v27 = vmul.f32 %v4314_v43, %v4158_v38  ;;  %v2053_v38 = vmul.f32 %v4314_v43, %v4168_v52 }
 0x255   : > { %2318 = vrot.lane.b32.xlu1 %v1832_v22, %s3067_s10  ;;  %v1799_v22 = vadd.f32 %v3786_v56, %v1767_v55  ;;  %v1056_v37 = vmax.f32 %v1024_v60, 0.0  ;;  %v1053_v40 = vmax.f32 %v1021_v28, 0.0  ;;  %v1770_v60 = vmul.f32 %v4314_v43, %v4142_v53 }
 0x256   : > { %v4277_v33 = vpop.f32.mrb[60].mxu1  ;;  %v2085_v28 = vadd.f32 %v4322_v7, %v2053_v38  ;;  %v1776_v38 = vmul.f32 %v4314_v43, %v4175_v34  ;;  %v990_v34 = vmul.f32 %v4314_v43, %v3956_v12 }
 0x257   : > { %2320 = vrot.lane.b32.xlu0 %v1833_v26, %s3067_s10  ;;  %v4283_v0 = vpop.f32.mrb[61].mxu1  ;;  %v1830_v26 = vmax.f32 %v1798_v57, 0.0  ;;  %v1831_v55 = vmax.f32 %v1799_v22, 0.0  ;;  %v2110_v57 = vmax.f32 %v2078_v47, 0.0  ;;  %v1022_v22 = vadd.f32 %v4322_v7, %v984_v17 }
 0x258   : > { %v4287_v25 = vpop.f32.mrb[62].mxu1  ;;  %v1836_v47 = vmax.f32 %v1804_v20, 0.0  ;;  %v2084_v17 = vadd.f32 %v4322_v7, %v2052_v27  ;;  %v1802_v20 = vadd.f32 %v4322_v7, %v1770_v60  ;;  %v1808_v60 = vadd.f32 %v4322_v7, %v1776_v38 }
 0x259   : > { %2446 = vrot.lane.b32.xlu1 %v2112_v42, %s3068_s11  ;;  %v4293_v11 = vpop.f32.mrb[63].mxu1  ;;  %v2079_v42 = vadd.f32 %v3786_v56, %v2047_v5  ;;  %v1028_v12 = vadd.f32 %v4322_v7, %v990_v34 }
 0x25a   : > { %v2116_v27 = vmax.f32 %v2084_v17, 0.0  ;;  %v2056_v17 = vmul.f32 %v4314_v43, %v4198_v4  ;;  %v1774_v4 = vmul.f32 %v4314_v43, %v4180_v23 }
 0x25b   : > { %2448 = vrot.lane.b32.xlu0 %v2113_v21, %s3068_s11  ;;  %v2111_v10 = vmax.f32 %v2079_v42, 0.0  ;;  %v1805_v21 = vadd.f32 %v4322_v7, %v1773_v32  ;;  %v1054_v42 = vmax.f32 %v1022_v22, 0.0  ;;  %v2117_v22 = vmax.f32 %v2085_v28, 0.0 }
 0x25c   : > { %v2088_v28 = vadd.f32 %v4322_v7, %v2056_v17 }
 0x25d   : > { %2314 = vrot.lane.b32.xlu1 %v1830_v26, %s3067_s10  ;;  %v1837_v52 = vmax.f32 %v1805_v21, 0.0 }
 0x25f   : > { %v2207_v5 = vpop.permute.xlu1 %2206  ;;  %2316 = vrot.lane.b32.xlu0 %v1831_v55, %s3067_s10 }
 0x260   : > { %v4326_v56 = vsel %vm689_vm7, %v1055_v9, %v2207_v5  ;;  %v1771_v9 = vmul.f32 %v4314_v43, %v4150_v50  ;;  %v2050_v5 = vmul.f32 %v4314_v43, %v4163_v48  ;;  %v2051_v50 = vmul.f32 %v4314_v43, %v4172_v2 }
 0x261   : > { %v2209_v18 = vpop.permute.xlu0 %2208  ;;  %2442 = vrot.lane.b32.xlu1 %v2110_v57, %s3068_s11  ;;  %v989_v2 = vmul.f32 %v4314_v43, %v3949_v16 }
 0x262   : > { %v4333_v26 = vsel %vm689_vm7, %v1056_v37, %v2209_v18  ;;  %v1803_v37 = vadd.f32 %v4322_v7, %v1771_v9  ;;  %v2082_v21 = vadd.f32 %v4322_v7, %v2050_v5  ;;  %v2083_v48 = vadd.f32 %v4322_v7, %v2051_v50 }
 0x263   : > { %v2203_v55 = vpop.permute.xlu1 %2202  ;;  %2444 = vrot.lane.b32.xlu0 %v2111_v10, %s3068_s11  ;;  %v1834_v10 = vmax.f32 %v1802_v20, 0.0  ;;  %v1027_v16 = vadd.f32 %v4322_v7, %v989_v2  ;;  %v1840_v9 = vmax.f32 %v1808_v60, 0.0  ;;  %v1775_v20 = vmul.f32 %v4314_v43, %v4191_v15 }
 0x264   : > { %v4340_v32 = vsel %vm689_vm7, %v1053_v40, %v2203_v55  ;;  %v1835_v18 = vmax.f32 %v1803_v37, 0.0  ;;  %v1777_v40 = vmul.f32 %v4314_v43, %v4186_v29  ;;  %v2115_v55 = vmax.f32 %v2083_v48, 0.0 }
 0x265   : > { %v2205_v57 = vpop.permute.xlu0 %2204  ;;  %2326 = vrot.lane.b32.xlu1 %v1836_v47, %s3067_s10  ;;  %v2114_v47 = vmax.f32 %v2082_v21, 0.0  ;;  %v2057_v29 = vmul.f32 %v4314_v43, %v4210_v35  ;;  %v988_v35 = vmul.f32 %v4314_v43, %v3961_v6  ;;  %v1806_v5 = vadd.f32 %v4322_v7, %v1774_v4 }
 0x266   : > { %v4347_v53 = vsel %vm689_vm7, %v1054_v42, %v2205_v57  ;;  %v1809_v42 = vadd.f32 %v4322_v7, %v1777_v40  ;;  %v2120_v37 = vmax.f32 %v2088_v28, 0.0  ;;  %v1060_v6 = vmax.f32 %v1028_v12, 0.0 }
 0x267   : > { %2328 = vrot.lane.b32.xlu0 %v1837_v52, %s3067_s10  ;;  %v987_v52 = vmul.f32 %v4314_v43, %v3954_v3  ;;  %v1059_v3 = vmax.f32 %v1027_v16, 0.0  ;;  %v1807_v21 = vadd.f32 %v4322_v7, %v1775_v20  ;;  %v1838_v2 = vmax.f32 %v1806_v5, 0.0 }
 0x268   : > { %v1841_v57 = vmax.f32 %v1809_v42, 0.0  ;;  %v1780_v60 = vmul.f32 %v4314_v43, %v4221_v8  ;;  %v2060_v4 = vmul.f32 %v4314_v43, %v4243_v14  ;;  %v1779_v14 = vmul.f32 %v4314_v43, %v4237_v36 }
 0x269   : > { %2454 = vrot.lane.b32.xlu1 %v2116_v27, %s3068_s11  ;;  %v2089_v27 = vadd.f32 %v4322_v7, %v2057_v29  ;;  %v1025_v23 = vadd.f32 %v4322_v7, %v987_v52  ;;  %v1781_v29 = vmul.f32 %v4314_v43, %v4232_v24  ;;  %v2061_v24 = vmul.f32 %v4314_v43, %v4251_v31 }
 0x26a   : > { %v2092_v20 = vadd.f32 %v4322_v7, %v2060_v4  ;;  %v993_v31 = vmul.f32 %v4314_v43, %v3993_v63  ;;  %v1811_v36 = vadd.f32 %v4322_v7, %v1779_v14 }
 0x26b   : > { %2456 = vrot.lane.b32.xlu0 %v2117_v22, %s3068_s11  ;;  %v2054_v22 = vmul.f32 %v4314_v43, %v4203_v1  ;;  %v2121_v38 = vmax.f32 %v2089_v27, 0.0  ;;  %v1057_v40 = vmax.f32 %v1025_v23, 0.0  ;;  %v1813_v12 = vadd.f32 %v4322_v7, %v1781_v29 }
 0x26c   : > { %v2124_v5 = vmax.f32 %v2092_v20, 0.0  ;;  %v1031_v63 = vadd.f32 %v4322_v7, %v993_v31 }
 0x26d   : > { %2322 = vrot.lane.b32.xlu1 %v1834_v10, %s3067_s10  ;;  %v1026_v10 = vadd.f32 %v4322_v7, %v988_v35  ;;  %v1845_v27 = vmax.f32 %v1813_v12, 0.0 }
 0x26f   : > { %2324 = vrot.lane.b32.xlu0 %v1835_v18, %s3067_s10  ;;  %v2055_v18 = vmul.f32 %v4314_v43, %v4215_v54  ;;  %v1058_v34 = vmax.f32 %v1026_v10, 0.0  ;;  %v1839_v54 = vmax.f32 %v1807_v21, 0.0  ;;  %v1784_v21 = vmul.f32 %v4314_v43, %v4259_v46 }
 0x271   : > { %2450 = vrot.lane.b32.xlu1 %v2114_v47, %s3068_s11  ;;  %v2086_v47 = vadd.f32 %v4322_v7, %v2054_v22  ;;  %v2087_v42 = vadd.f32 %v4322_v7, %v2055_v18  ;;  %v1816_v46 = vadd.f32 %v4322_v7, %v1784_v21 }
 0x273   : > { %2452 = vrot.lane.b32.xlu0 %v2115_v55, %s3068_s11  ;;  %v2118_v8 = vmax.f32 %v2086_v47, 0.0  ;;  %v2119_v28 = vmax.f32 %v2087_v42, 0.0  ;;  %v1782_v47 = vmul.f32 %v4314_v43, %v4261_v62  ;;  %v1783_v42 = vmul.f32 %v4314_v43, %v4269_v45 }
 0x275   : > { %2334 = vrot.lane.b32.xlu1 %v1840_v9, %s3067_s10  ;;  %v1812_v9 = vadd.f32 %v4322_v7, %v1780_v60  ;;  %v1814_v4 = vadd.f32 %v4322_v7, %v1782_v47 }
 0x277   : > { %v2215_v50 = vpop.permute.xlu1 %2214  ;;  %2336 = vrot.lane.b32.xlu0 %v1841_v57, %s3067_s10  ;;  %v1844_v35 = vmax.f32 %v1812_v9, 0.0  ;;  %v1778_v57 = vmul.f32 %v4314_v43, %v4226_v58  ;;  %v2058_v58 = vmul.f32 %v4314_v43, %v4248_v61  ;;  %v2062_v9 = vmul.f32 %v4314_v43, %v4283_v0 }
 0x278   : > { %v4398_v15 = vsel %vm689_vm7, %v1059_v3, %v2215_v50  ;;  %v2093_v3 = vadd.f32 %v4322_v7, %v2061_v24  ;;  %v2059_v50 = vmul.f32 %v4314_v43, %v4256_v59  ;;  %v992_v59 = vmul.f32 %v4314_v43, %v4005_v19 }
 0x279   : > { %v2217_v48 = vpop.permute.xlu0 %2216  ;;  %2462 = vrot.lane.b32.xlu1 %v2120_v37, %s3068_s11  ;;  %v1810_v23 = vadd.f32 %v4322_v7, %v1778_v57  ;;  %v994_v37 = vmul.f32 %v4314_v43, %v4000_v44  ;;  %v2090_v61 = vadd.f32 %v4322_v7, %v2058_v58  ;;  %v1815_v57 = vadd.f32 %v4322_v7, %v1783_v42  ;;  %v4704_v42 = vld [vmem:[#allocation4_spill] sm:$0xff] }
 0x27a   : > { %v4405_v1 = vsel %vm689_vm7, %v1060_v6, %v2217_v48  ;;  %v2125_v22 = vmax.f32 %v2093_v3, 0.0  ;;  %v991_v6 = vmul.f32 %v4314_v43, %v3998_v51  ;;  %v2091_v18 = vadd.f32 %v4322_v7, %v2059_v50 }
 0x27b   : > { %v2211_v17 = vpop.permute.xlu1 %2210  ;;  %2464 = vrot.lane.b32.xlu0 %v2121_v38, %s3068_s11  ;;  %v1842_v10 = vmax.f32 %v1810_v23, 0.0  ;;  %v1032_v44 = vadd.f32 %v4322_v7, %v994_v37  ;;  %v1843_v38 = vmax.f32 %v1811_v36, 0.0  ;;  %v1785_v48 = vmul.f32 %v4314_v43, %v4267_v39 }
 0x27c   : > { %v4412_v55 = vsel %vm689_vm7, %v1057_v40, %v2211_v17  ;;  %v1063_v51 = vmax.f32 %v1031_v63, 0.0  ;;  %v1029_v40 = vadd.f32 %v4322_v7, %v991_v6  ;;  %v1030_v17 = vadd.f32 %v4322_v7, %v992_v59 }
 0x27d   : > { %v2213_v16 = vpop.permute.xlu0 %2212  ;;  %2330 = vrot.lane.b32.xlu1 %v1838_v2, %s3067_s10  ;;  %v2122_v2 = vmax.f32 %v2090_v61, 0.0  ;;  %v1064_v19 = vmax.f32 %v1032_v44, 0.0  ;;  %v2123_v39 = vmax.f32 %v2091_v18, 0.0  ;;  %v2094_v14 = vadd.f32 %v4322_v7, %v2062_v9  ;;  %v4705_v9 = vld [vmem:[#allocation5_spill] sm:$0xff] }
 0x27e   : > { %v4419_v52 = vsel %vm689_vm7, %v1058_v34, %v2213_v16  ;;  %v1061_v16 = vmax.f32 %v1029_v40, 0.0  ;;  %v1062_v12 = vmax.f32 %v1030_v17, 0.0  ;;  %v1846_v3 = vmax.f32 %v1814_v4, 0.0 }
 0x27f   : > { %2332 = vrot.lane.b32.xlu0 %v1839_v54, %s3067_s10  ;;  %v1817_v54 = vadd.f32 %v4322_v7, %v1785_v48  ;;  %v2126_v37 = vmax.f32 %v2094_v14, 0.0 }
 0x281   : > { %2458 = vrot.lane.b32.xlu1 %v2118_v8, %s3068_s11  ;;  %v1848_v8 = vmax.f32 %v1816_v46, 0.0  ;;  %v1849_v24 = vmax.f32 %v1817_v54, 0.0 }
 0x283   : > { %2460 = vrot.lane.b32.xlu0 %v2119_v28, %s3068_s11 }
 0x285   : > { %2342 = vrot.lane.b32.xlu1 %v1844_v35, %s3067_s10  ;;  %v2063_v35 = vmul.f32 %v4314_v43, %v4293_v11  ;;  %v2065_v11 = vmul.f32 %v4314_v43, %v4287_v25 }
 0x287   : > { %2344 = vrot.lane.b32.xlu0 %v1845_v27, %s3067_s10  ;;  %v2064_v27 = vmul.f32 %v4314_v43, %v4277_v33  ;;  %v2095_v23 = vadd.f32 %v4322_v7, %v2063_v35 }
 0x289   : > { %2470 = vrot.lane.b32.xlu1 %v2124_v5, %s3068_s11  ;;  %v1847_v5 = vmax.f32 %v1815_v57, 0.0  ;;  %v2096_v33 = vadd.f32 %v4322_v7, %v2064_v27  ;;  %v2127_v50 = vmax.f32 %v2095_v23, 0.0  ;;  %v4706_v57 = vld [vmem:[#allocation6_spill] sm:$0xff] }
 0x28b   : > { %2472 = vrot.lane.b32.xlu0 %v2125_v22, %s3068_s11  ;;  %v2097_v22 = vadd.f32 %v4322_v7, %v2065_v11 }
 0x28d   : > { %2338 = vrot.lane.b32.xlu1 %v1842_v10, %s3067_s10  ;;  %v2129_v7 = vmax.f32 %v2097_v22, 0.0 }
 0x28f   : > { %v2223_v60 = vpop.permute.xlu1 %2222  ;;  %2340 = vrot.lane.b32.xlu0 %v1843_v38, %s3067_s10 }
 0x290   : > { %v4470_v34 = vsel %vm689_vm7, %v1063_v51, %v2223_v60  ;;  %v4703_v60 = vld [vmem:[#allocation3_spill] sm:$0xff] }
 0x291   : > { %v2225_v29 = vpop.permute.xlu0 %2224  ;;  %2466 = vrot.lane.b32.xlu1 %v2122_v2, %s3068_s11 }
 0x292   : > { %v4477_v62 = vsel %vm689_vm7, %v1064_v19, %v2225_v29 }
 0x293   : > { %v2219_v28 = vpop.permute.xlu1 %2218  ;;  %2468 = vrot.lane.b32.xlu0 %v2123_v39, %s3068_s11 }
 0x294   : > { %v4484_v45 = vsel %vm689_vm7, %v1061_v16, %v2219_v28 }
 0x295   : > { %v2221_v20 = vpop.permute.xlu0 %2220  ;;  %2350 = vrot.lane.b32.xlu1 %v1848_v8, %s3067_s10 }
 0x296   : > { %v4491_v0 = vsel %vm689_vm7, %v1062_v12, %v2221_v20 }
 0x297   : > { %v2295_v31 = vpop.permute.xlu1 %2294  ;;  %2352 = vrot.lane.b32.xlu0 %v1849_v24, %s3067_s10 }
 0x298   : > { %v2548_v25 = vsel %vm763_vm9, %v3924_v13, %v2295_v31  ;;  %v2128_v13 = vmax.f32 %v2096_v33, 0.0  ;;  %v4708_v33 = vld [vmem:[#allocation8_spill] sm:$0xff] }
 0x299   : > { %v2297_v58 = vpop.permute.xlu0 %2296  ;;  %2346 = vrot.lane.b32.xlu1 %v1846_v3, %s3067_s10  ;;  %v4707_v3 = vld [vmem:[#allocation7_spill] sm:$0xff] }
 0x29a   : > { %v2549_v63 = vsel %vm763_vm9, %v3929_v30, %v2297_v58 }
 0x29b   : > { %v2423_v43 = vpop.permute.xlu1 %2422  ;;  %2348 = vrot.lane.b32.xlu0 %v1847_v5, %s3067_s10 }
 0x29c   : > { %v2581_v36 = vsel %vm2578_vm10, %v2548_v25, %v2423_v43 }
 0x29d   : > { %2614 = vst.msk [vmem:[%s4505_s21 + $0x10] sm:$0xff] %vm2611_vm11, %v2581_v36  ;;  %v2425_v6 = vpop.permute.xlu0 %2424  ;;  %2474 = vrot.lane.b32.xlu1 %v2126_v37, %s3068_s11  ;;  %v4709_v36 = vld [vmem:[#allocation9_spill] sm:$0xff] }
 0x29e   : > { %v2582_v10 = vsel %vm2578_vm10, %v2549_v63, %v2425_v6 }
 0x29f   : > { %2615 = vst.msk [vmem:[%s4505_s21 + $0x18] sm:$0xff] %vm2611_vm11, %v2582_v10  ;;  %v2291_v61 = vpop.permute.xlu1 %2290  ;;  %2476 = vrot.lane.b32.xlu0 %v2127_v50, %s3068_s11 }
 0x2a0   : > { %v2546_v30 = vsel %vm763_vm9, %v3935_v49, %v2291_v61  ;;  %v4702_v49 = vld [vmem:[#allocation2_spill] sm:$0xff] }
 0x2a1   : > { %v2293_v21 = vpop.permute.xlu0 %2292  ;;  %2478 = vrot.lane.b32.xlu1 %v2128_v13, %s3068_s11  ;;  %v4710_v13 = vld [vmem:[#allocation10_spill] sm:$0xff] }
 0x2a2   : > { %v2547_v38 = vsel %vm763_vm9, %v3940_v41, %v2293_v21 }
 0x2a3   : > { %v2419_v44 = vpop.permute.xlu1 %2418  ;;  %2480 = vrot.lane.b32.xlu0 %v2129_v7, %s3068_s11 }
 0x2a4   : > { %v2579_v59 = vsel %vm2578_vm10, %v2546_v30, %v2419_v44  ;;  %v4711_v30 = vld [vmem:[#allocation11_spill] sm:$0xff] }
 0x2a5   : > { %2612 = vst.msk [vmem:[%s4505_s21] sm:$0xff] %vm2611_vm11, %v2579_v59  ;;  %v2421_v18 = vpop.permute.xlu0 %2420 }
 0x2a6   : > { %v2580_v48 = vsel %vm2578_vm10, %v2547_v38, %v2421_v18 }
 0x2a7   : > { %2613 = vst.msk [vmem:[%s4505_s21 + $0x8] sm:$0xff] %vm2611_vm11, %v2580_v48  ;;  %v2303_v51 = vpop.permute.xlu1 %2302 }
 0x2a8   : > { %v2552_v2 = vsel %vm763_vm9, %v4702_v49, %v2303_v51  ;;  %v4712_v51 = vld [vmem:[#allocation12_spill] sm:$0xff] }
 0x2a9   : > { %v2305_v40 = vpop.permute.xlu0 %2304 }
 0x2aa   : > { %v2553_v41 = vsel %vm763_vm9, %v4703_v60, %v2305_v40 }
 0x2ab   : > { %v2431_v46 = vpop.permute.xlu1 %2430 }
 0x2ac   : > { %v2585_v47 = vsel %vm2578_vm10, %v2552_v2, %v2431_v46  ;;  %v4713_v46 = vld [vmem:[#allocation13_spill] sm:$0xff] }
 0x2ad   : > { %2618 = vst.msk [vmem:[%s4505_s21 + $0x30] sm:$0xff] %vm2611_vm11, %v2585_v47  ;;  %v2433_v19 = vpop.permute.xlu0 %2432 }
 0x2ae   : > { %v2586_v17 = vsel %vm2578_vm10, %v2553_v41, %v2433_v19 }
 0x2af   : > { %2619 = vst.msk [vmem:[%s4505_s21 + $0x38] sm:$0xff] %vm2611_vm11, %v2586_v17  ;;  %v2299_v39 = vpop.permute.xlu1 %2298 }
 0x2b0   : > { %v2550_v29 = vsel %vm763_vm9, %v4704_v42, %v2299_v39  ;;  %v4714_v39 = vld [vmem:[#allocation14_spill] sm:$0xff] }
 0x2b1   : > { %v2301_v54 = vpop.permute.xlu0 %2300 }
 0x2b2   : > { %v2551_v4 = vsel %vm763_vm9, %v4705_v9, %v2301_v54 }
 0x2b3   : > { %v2427_v16 = vpop.permute.xlu1 %2426 }
 0x2b4   : > { %v2583_v8 = vsel %vm2578_vm10, %v2550_v29, %v2427_v16  ;;  %v4715_v16 = vld [vmem:[#allocation15_spill] sm:$0xff] }
 0x2b5   : > { %2616 = vst.msk [vmem:[%s4505_s21 + $0x20] sm:$0xff] %vm2611_vm11, %v2583_v8  ;;  %v2429_v28 = vpop.permute.xlu0 %2428 }
 0x2b6   : > { %v2584_v12 = vsel %vm2578_vm10, %v2551_v4, %v2429_v28 }
 0x2b7   : > { %2617 = vst.msk [vmem:[%s4505_s21 + $0x28] sm:$0xff] %vm2611_vm11, %v2584_v12  ;;  %v2311_v24 = vpop.permute.xlu1 %2310 }
 0x2b8   : > { %v2556_v20 = vsel %vm763_vm9, %v4706_v57, %v2311_v24  ;;  %v4716_v24 = vld [vmem:[#allocation16_spill] sm:$0xff] }
 0x2b9   : > { %v2313_v35 = vpop.permute.xlu0 %2312 }
 0x2ba   : > { %v2557_v31 = vsel %vm763_vm9, %v4707_v3, %v2313_v35 }
 0x2bb   : > { %v2439_v27 = vpop.permute.xlu1 %2438 }
 0x2bc   : > { %v2589_v14 = vsel %vm2578_vm10, %v2556_v20, %v2439_v27  ;;  %v4717_v27 = vld [vmem:[#allocation17_spill] sm:$0xff] }
 0x2bd   : > { %2622 = vst.msk [vmem:[%s4505_s21 + $0x50] sm:$0xff] %vm2611_vm11, %v2589_v14  ;;  %v2441_v11 = vpop.permute.xlu0 %2440 }
 0x2be   : > { %v2590_v23 = vsel %vm2578_vm10, %v2557_v31, %v2441_v11 }
 0x2bf   : > { %2623 = vst.msk [vmem:[%s4505_s21 + $0x58] sm:$0xff] %vm2611_vm11, %v2590_v23  ;;  %v2307_v5 = vpop.permute.xlu1 %2306 }
 0x2c0   : > { %v2554_v37 = vsel %vm763_vm9, %v4708_v33, %v2307_v5 }
 0x2c1   : > { %v2309_v58 = vpop.permute.xlu0 %2308 }
 0x2c2   : > { %v2555_v22 = vsel %vm763_vm9, %v4709_v36, %v2309_v58 }
 0x2c3   : > { %v2435_v25 = vpop.permute.xlu1 %2434 }
 0x2c4   : > { %v2587_v43 = vsel %vm2578_vm10, %v2554_v37, %v2435_v25 }
 0x2c5   : > { %2620 = vst.msk [vmem:[%s4505_s21 + $0x40] sm:$0xff] %vm2611_vm11, %v2587_v43  ;;  %v2437_v50 = vpop.permute.xlu0 %2436 }
 0x2c6   : > { %v2588_v63 = vsel %vm2578_vm10, %v2555_v22, %v2437_v50 }
 0x2c7   : > { %2621 = vst.msk [vmem:[%s4505_s21 + $0x48] sm:$0xff] %vm2611_vm11, %v2588_v63  ;;  %v2319_v6 = vpop.permute.xlu1 %2318 }
 0x2c8   : > { %v2560_v61 = vsel %vm763_vm9, %v4710_v13, %v2319_v6 }
 0x2c9   : > { %v2321_v10 = vpop.permute.xlu0 %2320 }
 0x2ca   : > { %v2561_v44 = vsel %vm763_vm9, %v4711_v30, %v2321_v10 }
 0x2cb   : > { %v2447_v7 = vpop.permute.xlu1 %2446 }
 0x2cc   : > { %v2593_v21 = vsel %vm2578_vm10, %v2560_v61, %v2447_v7 }
 0x2cd   : > { %2626 = vst.msk [vmem:[%s4505_s21 + $0x70] sm:$0xff] %vm2611_vm11, %v2593_v21  ;;  %v2449_v59 = vpop.permute.xlu0 %2448 }
 0x2ce   : > { %v2594_v38 = vsel %vm2578_vm10, %v2561_v44, %v2449_v59 }
 0x2cf   : > { %2627 = vst.msk [vmem:[%s4505_s21 + $0x78] sm:$0xff] %vm2611_vm11, %v2594_v38  ;;  %v2315_v18 = vpop.permute.xlu1 %2314 }
 0x2d0   : > { %v2558_v40 = vsel %vm763_vm9, %v4712_v51, %v2315_v18 }
 0x2d1   : > { %v2317_v48 = vpop.permute.xlu0 %2316 }
 0x2d2   : > { %v2559_v47 = vsel %vm763_vm9, %v4713_v46, %v2317_v48 }
 0x2d3   : > { %v2443_v49 = vpop.permute.xlu1 %2442 }
 0x2d4   : > { %v2591_v2 = vsel %vm2578_vm10, %v2558_v40, %v2443_v49 }
 0x2d5   : > { %2624 = vst.msk [vmem:[%s4505_s21 + $0x60] sm:$0xff] %vm2611_vm11, %v2591_v2  ;;  %v2445_v60 = vpop.permute.xlu0 %2444 }
 0x2d6   : > { %v2592_v41 = vsel %vm2578_vm10, %v2559_v47, %v2445_v60 }
 0x2d7   : > { %2625 = vst.msk [vmem:[%s4505_s21 + $0x68] sm:$0xff] %vm2611_vm11, %v2592_v41  ;;  %v2327_v19 = vpop.permute.xlu1 %2326 }
 0x2d8   : > { %v2564_v54 = vsel %vm763_vm9, %v4714_v39, %v2327_v19 }
 0x2d9   : > { %v2329_v17 = vpop.permute.xlu0 %2328 }
 0x2da   : > { %v2565_v8 = vsel %vm763_vm9, %v4715_v16, %v2329_v17 }
 0x2db   : > { %v2455_v42 = vpop.permute.xlu1 %2454 }
 0x2dc   : > { %v2597_v29 = vsel %vm2578_vm10, %v2564_v54, %v2455_v42 }
 0x2dd   : > { %2630 = vst.msk [vmem:[%s4505_s21 + $0x90] sm:$0xff] %vm2611_vm11, %v2597_v29  ;;  %v2457_v9 = vpop.permute.xlu0 %2456 }
 0x2de   : > { %v2598_v4 = vsel %vm2578_vm10, %v2565_v8, %v2457_v9 }
 0x2df   : > { %2631 = vst.msk [vmem:[%s4505_s21 + $0x98] sm:$0xff] %vm2611_vm11, %v2598_v4  ;;  %v2323_v28 = vpop.permute.xlu1 %2322 }
 0x2e0   : > { %v2562_v35 = vsel %vm763_vm9, %v4716_v24, %v2323_v28 }
 0x2e1   : > { %v2325_v12 = vpop.permute.xlu0 %2324 }
 0x2e2   : > { %v2563_v14 = vsel %vm763_vm9, %v4717_v27, %v2325_v12 }
 0x2e3   : > { %v2451_v57 = vpop.permute.xlu1 %2450 }
 0x2e4   : > { %v2595_v20 = vsel %vm2578_vm10, %v2562_v35, %v2451_v57 }
 0x2e5   : > { %2628 = vst.msk [vmem:[%s4505_s21 + $0x80] sm:$0xff] %vm2611_vm11, %v2595_v20  ;;  %v2453_v3 = vpop.permute.xlu0 %2452 }
 0x2e6   : > { %v2596_v31 = vsel %vm2578_vm10, %v2563_v14, %v2453_v3 }
 0x2e7   : > { %2629 = vst.msk [vmem:[%s4505_s21 + $0x88] sm:$0xff] %vm2611_vm11, %v2596_v31  ;;  %v2335_v11 = vpop.permute.xlu1 %2334 }
 0x2e8   : > { %v2568_v5 = vsel %vm763_vm9, %v4326_v56, %v2335_v11 }
 0x2e9   : > { %v2337_v23 = vpop.permute.xlu0 %2336 }
 0x2ea   : > { %v2569_v37 = vsel %vm763_vm9, %v4333_v26, %v2337_v23 }
 0x2eb   : > { %v2463_v58 = vpop.permute.xlu1 %2462 }
 0x2ec   : > { %v2601_v33 = vsel %vm2578_vm10, %v2568_v5, %v2463_v58 }
 0x2ed   : > { %2634 = vst.msk [vmem:[%s4505_s21 + $0xb0] sm:$0xff] %vm2611_vm11, %v2601_v33  ;;  %v2465_v25 = vpop.permute.xlu0 %2464 }
 0x2ee   : > { %v2602_v43 = vsel %vm2578_vm10, %v2569_v37, %v2465_v25 }
 0x2ef   : > { %2635 = vst.msk [vmem:[%s4505_s21 + $0xb8] sm:$0xff] %vm2611_vm11, %v2602_v43  ;;  %v2331_v36 = vpop.permute.xlu1 %2330 }
 0x2f0   : > { %v2566_v56 = vsel %vm763_vm9, %v4340_v32, %v2331_v36 }
 0x2f1   : > { %v2333_v22 = vpop.permute.xlu0 %2332 }
 0x2f2   : > { %v2567_v26 = vsel %vm763_vm9, %v4347_v53, %v2333_v22 }
 0x2f3   : > { %v2459_v50 = vpop.permute.xlu1 %2458 }
 0x2f4   : > { %v2599_v63 = vsel %vm2578_vm10, %v2566_v56, %v2459_v50 }
 0x2f5   : > { %2632 = vst.msk [vmem:[%s4505_s21 + $0xa0] sm:$0xff] %vm2611_vm11, %v2599_v63  ;;  %v2461_v6 = vpop.permute.xlu0 %2460 }
 0x2f6   : > { %v2600_v10 = vsel %vm2578_vm10, %v2567_v26, %v2461_v6 }
 0x2f7   : > { %2633 = vst.msk [vmem:[%s4505_s21 + $0xa8] sm:$0xff] %vm2611_vm11, %v2600_v10  ;;  %v2343_v13 = vpop.permute.xlu1 %2342 }
 0x2f8   : > { %v2572_v32 = vsel %vm763_vm9, %v4398_v15, %v2343_v13 }
 0x2f9   : > { %v2345_v61 = vpop.permute.xlu0 %2344 }
 0x2fa   : > { %v2573_v53 = vsel %vm763_vm9, %v4405_v1, %v2345_v61 }
 0x2fb   : > { %v2471_v7 = vpop.permute.xlu1 %2470 }
 0x2fc   : > { %v2605_v21 = vsel %vm2578_vm10, %v2572_v32, %v2471_v7 }
 0x2fd   : > { %2638 = vst.msk [vmem:[%s4505_s21 + $0xd0] sm:$0xff] %vm2611_vm11, %v2605_v21  ;;  %v2473_v30 = vpop.permute.xlu0 %2472 }
 0x2fe   : > { %v2606_v44 = vsel %vm2578_vm10, %v2573_v53, %v2473_v30 }
 0x2ff   : > { %2639 = vst.msk [vmem:[%s4505_s21 + $0xd8] sm:$0xff] %vm2611_vm11, %v2606_v44  ;;  %v2339_v59 = vpop.permute.xlu1 %2338 }
 0x300   : > { %v2570_v18 = vsel %vm763_vm9, %v4412_v55, %v2339_v59 }
 0x301   : > { %v2341_v38 = vpop.permute.xlu0 %2340 }
 0x302   : > { %v2571_v51 = vsel %vm763_vm9, %v4419_v52, %v2341_v38 }
 0x303   : > { %v2467_v15 = vpop.permute.xlu1 %2466 }
 0x304   : > { %v2603_v48 = vsel %vm2578_vm10, %v2570_v18, %v2467_v15 }
 0x305   : > { %2636 = vst.msk [vmem:[%s4505_s21 + $0xc0] sm:$0xff] %vm2611_vm11, %v2603_v48  ;;  %v2469_v1 = vpop.permute.xlu0 %2468 }
 0x306   : > { %v2604_v40 = vsel %vm2578_vm10, %v2571_v51, %v2469_v1 }
 0x307   : > { %2637 = vst.msk [vmem:[%s4505_s21 + $0xc8] sm:$0xff] %vm2611_vm11, %v2604_v40  ;;  %v2351_v49 = vpop.permute.xlu1 %2350 }
 0x308   : > { %v2576_v39 = vsel %vm763_vm9, %v4470_v34, %v2351_v49 }
 0x309   : > { %v2353_v2 = vpop.permute.xlu0 %2352 }
 0x30b   : > { %v2347_v46 = vpop.permute.xlu1 %2346 }
 0x30c   : > { %v2574_v47 = vsel %vm763_vm9, %v4484_v45, %v2347_v46  ;;  %v2577_v45 = vsel %vm763_vm9, %v4477_v62, %v2353_v2 }
 0x30d   : > { %v2349_v55 = vpop.permute.xlu0 %2348 }
 0x30e   : > { %v2575_v41 = vsel %vm763_vm9, %v4491_v0, %v2349_v55 }
 0x30f   : > { %v2475_v60 = vpop.permute.xlu1 %2474 }
 0x310   : > { %v2607_v52 = vsel %vm2578_vm10, %v2574_v47, %v2475_v60 }
 0x311   : > { %2640 = vst.msk [vmem:[%s4505_s21 + $0xe0] sm:$0xff] %vm2611_vm11, %v2607_v52  ;;  %v2477_v19 = vpop.permute.xlu0 %2476 }
 0x312   : > { %v2608_v17 = vsel %vm2578_vm10, %v2575_v41, %v2477_v19 }
 0x313   : > { %2641 = vst.msk [vmem:[%s4505_s21 + $0xe8] sm:$0xff] %vm2611_vm11, %v2608_v17  ;;  %v2479_v54 = vpop.permute.xlu1 %2478 }
 0x314   : > { %v2609_v42 = vsel %vm2578_vm10, %v2576_v39, %v2479_v54 }
 0x315   : > { %2642 = vst.msk [vmem:[%s4505_s21 + $0xf0] sm:$0xff] %vm2611_vm11, %v2609_v42  ;;  %v2481_v29 = vpop.permute.xlu0 %2480 }
 0x316   : > { %v2610_v0 = vsel %vm2578_vm10, %v2577_v45, %v2481_v29 }
 0x317   : > { %2643 = vst.msk [vmem:[%s4505_s21 + $0xf8] sm:$0xff] %vm2611_vm11, %v2610_v0 }
 0x318 PF: > { %s14_s15 = sadd.s32 1, %s3061_s15  }
 0x319   : > { %p11_p4 = scmp.ge.s32.totalorder %s14_s15, 4  }
 0x31b   :  { %13 = sbr.rel (!%p11_p4) target bundleno = 1 (0x1), region = 69 }

</bundles_post_ra>
